<compile_context>
chip_gen: v7x
topology: tpu7x:2x2x1
jax: 0.10.0
libtpu: 0.0.40
codegen_flags: <defaults>
</compile_context>

<pallas_src>
import functools
from typing import NamedTuple, Optional

import jax
import jax.numpy as jnp
from jax.experimental import pallas as pl
from jax.experimental.pallas import tpu as pltpu


_LEAKY_SLOPE = 0.2
_VMEM_LIMIT = 32 * 1024 * 1024          # safe on v5e/v6e/v7x (>=64 MiB physical)
_TILE_BUDGET = 10 * 1024 * 1024         # VMEM budget for one conv call's live tiles


# ----------------------------------------------------------------------------- helpers
def _round_up(x, m):
    return ((x + m - 1) // m) * m


def _plan_tk(k):
    """Pick a K tile that divides K (K = 16*Cin, always a multiple of 16)."""
    kmax = 2048
    if k <= kmax:
        return k
    for tk in range(kmax, 0, -16):
        if k % tk == 0:
            return tk
    return k


def _pick_tm(mp, tk, cout_p):
    """Largest M tile (multiple of 128) fitting the VMEM budget, with >=2 grid steps."""
    tm = 128
    for cand in (2048, 1024, 512, 256, 128):
        if mp % cand:
            continue
        need = (2 * tk * cand * 2          # A, double-buffered, bf16
                + 2 * cout_p * tk * 2      # W, double-buffered, bf16
                + 2 * cout_p * cand * 2    # out, double-buffered, bf16
                + cout_p * cand * 4)       # f32 accumulator scratch
        if need <= _TILE_BUDGET:
            tm = cand
            break
    if mp // tm < 2:                       # keep both v7x TensorCores busy
        tm = max(128, mp // 2)
    return tm


# ----------------------------------------------------------------------------- kernels
def _conv_mm_kernel(w_ref, a_ref, c_ref, o_ref, acc_ref, *, act):
    """Transposed conv GEMM:  (Cout, TK) @ (TK, TM) accumulated over the K grid axis.

    w_ref: (Cout_p, TK) bf16   a_ref: (TK, TM) bf16   c_ref: (Cout_p, 1) f32 (bias+BN)
    o_ref: (Cout_p, TM) bf16   acc_ref: (Cout_p, TM) f32 scratch accumulator
    """
    @pl.when(pl.program_id(1) == 0)
    def _init():
        acc_ref[...] = jnp.zeros_like(acc_ref)

    acc_ref[...] += jnp.dot(w_ref[...], a_ref[...],
                            preferred_element_type=jnp.float32)

    @pl.when(pl.program_id(1) == pl.num_programs(1) - 1)
    def _finalize():
        y = acc_ref[...] + c_ref[...]                 # folded conv-bias + BatchNorm
        if act == "leaky_relu":
            y = jnp.where(y > 0, y, _LEAKY_SLOPE * y)
        elif act == "sigmoid":
            y = jax.nn.sigmoid(y)
        elif act is not None:
            raise ValueError(f"unsupported activation {act!r}")
        o_ref[...] = y.astype(o_ref.dtype)


def _avgpool_kernel(x_ref, aw_ref, ah_ref, o_ref):
    """Separable 3x3/s2/p1 average pool as two small matmuls per image.

    x_ref: (TB, H, W) bf16   aw_ref: (W, Wo) f32   ah_ref: (Ho, H) f32
    o_ref: (TB, Ho, Wo) bf16
    """
    aw = aw_ref[...]
    ah = ah_ref[...]
    for b in range(x_ref.shape[0]):                    # small static unroll
        xb = x_ref[b].astype(jnp.float32)              # (H, W)
        t = jnp.dot(xb, aw, preferred_element_type=jnp.float32)   # (H, Wo)
        o_ref[b] = jnp.dot(ah, t, preferred_element_type=jnp.float32).astype(o_ref.dtype)


# ----------------------------------------------------------------------------- glue
def _im2col_t(x, kh, kw, stride, pad):
    """x: (C, N, H, W) -> patches (K, M), K = kh*kw*C ordered (kh, kw, c), M = N*Ho*Wo."""
    c, n, h, w = x.shape
    xp = jnp.pad(x, ((0, 0), (0, 0), (pad, pad), (pad, pad)))
    hp, wp = h + 2 * pad, w + 2 * pad
    ho = (hp - kh) // stride + 1
    wo = (wp - kw) // stride + 1
    taps = []
    for i in range(kh):
        for j in range(kw):
            taps.append(xp[:, :, i:i + stride * ho:stride, j:j + stride * wo:stride])
    pat = jnp.stack(taps, axis=0)                      # (kh*kw, C, N, Ho, Wo)
    return pat.reshape(kh * kw * c, n * ho * wo), (n, ho, wo)


def _pool_matrix(size_in, size_out):
    """(size_in, size_out) matrix with 1/3 at rows {2o-1, 2o, 2o+1} for column o.

    Zero padding + count_include_pad are folded in: out-of-range taps simply
    contribute 0 while the divisor stays 9 (= 3*3 from the two 1/3 factors).
    """
    i = jnp.arange(size_in)[:, None]
    o = jnp.arange(size_out)[None, :]
    hit = (i >= 2 * o - 1) & (i <= 2 * o + 1)
    return jnp.where(hit, jnp.float32(1.0 / 3.0), jnp.float32(0.0))


class LayerCfg(NamedTuple):
    cin: int
    cout: int
    stride: int
    pad: int
    bn: bool
    act: Optional[str]


# ----------------------------------------------------------------------------- conv block
def conv_block_forward(x, p, cfg):
    """One ConvBlock: conv4x4 + folded BN + activation.  x: (C, N, H, W) bf16."""
    patches, (n, ho, wo) = _im2col_t(x, 4, 4, cfg.stride, cfg.pad)    # (K, M) bf16
    k, m = patches.shape
    cout_p = p["wt"].shape[0]

    mp = _round_up(m, 256)                       # pad M so tiles stay big & lane-dense
    a = jnp.pad(patches, ((0, 0), (0, mp - m)))
    tk = _plan_tk(k)
    tm = _pick_tm(mp, tk, cout_p)
    grid = (mp // tm, k // tk)

    flops = 2 * cout_p * k * mp
    transcendentals = cout_p * mp if cfg.act == "sigmoid" else 0
    bytes_accessed = a.size * 2 + p["wt"].size * 2 + cout_p * mp * 2 + cout_p * 4

    out = pl.pallas_call(
        functools.partial(_conv_mm_kernel, act=cfg.act),
        out_shape=jax.ShapeDtypeStruct((cout_p, mp), jnp.bfloat16),
        grid=grid,
        in_specs=[
            pl.BlockSpec((cout_p, tk), lambda i, kk: (0, kk)),
            pl.BlockSpec((tk, tm), lambda i, kk: (kk, i)),
            pl.BlockSpec((cout_p, 1), lambda i, kk: (0, 0)),
        ],
        out_specs=pl.BlockSpec((cout_p, tm), lambda i, kk: (0, i)),
        scratch_shapes=[pltpu.VMEM((cout_p, tm), jnp.float32)],
        compiler_params=pltpu.CompilerParams(
            dimension_semantics=("parallel", "arbitrary"),
            vmem_limit_bytes=_VMEM_LIMIT),
        cost_estimate=pl.CostEstimate(flops=int(flops),
                                      transcendentals=int(transcendentals),
                                      bytes_accessed=int(bytes_accessed)),
    )(p["wt"], a, p["c"])
    return out[:cfg.cout, :m].reshape(cfg.cout, n, ho, wo)


# ----------------------------------------------------------------------------- avg pool
def avg_pool_3x3_s2_p1(x):
    """AvgPool2d(3, 3, stride=2, padding=1, count_include_pad=True). x: (C, N, H, W)."""
    c, n, h, w = x.shape
    ho = (h + 2 - 3) // 2 + 1
    wo = (w + 2 - 3) // 2 + 1
    aw = _pool_matrix(w, wo)                       # (W, Wo)
    ah = _pool_matrix(h, ho).T                     # (Ho, H)

    cn = c * n
    tb_cap = max(1, (4 * 1024 * 1024) // (h * w * 2 * 2))   # keep input block <= ~4 MiB
    tb = min(8, tb_cap, max(1, cn // 2))
    cnp = _round_up(cn, tb)
    x2 = x.reshape(cn, h, w)
    if cnp != cn:
        x2 = jnp.pad(x2, ((0, cnp - cn), (0, 0), (0, 0)))

    out = pl.pallas_call(
        _avgpool_kernel,
        out_shape=jax.ShapeDtypeStruct((cnp, ho, wo), x.dtype),
        grid=(cnp // tb,),
        in_specs=[
            pl.BlockSpec((tb, h, w), lambda i: (i, 0, 0)),
            pl.BlockSpec((w, wo), lambda i: (0, 0)),
            pl.BlockSpec((ho, h), lambda i: (0, 0)),
        ],
        out_specs=pl.BlockSpec((tb, ho, wo), lambda i: (i, 0, 0)),
        compiler_params=pltpu.CompilerParams(
            dimension_semantics=("parallel",),
            vmem_limit_bytes=_VMEM_LIMIT),
    )(x2, aw, ah)
    return out[:cn].reshape(c, n, ho, wo)


# ----------------------------------------------------------------------------- model setup
def _encode_layer_cfgs(in_c, out_c, basic_c, layers_num, activate):
    max_c = basic_c * 2 ** layers_num
    cfgs = [LayerCfg(in_c, basic_c, 2, 1, True, "leaky_relu")]
    cur_in, cur_basic = in_c, basic_c
    for _ in range(1, layers_num):
        cur_in = cur_basic
        cur_basic = min(2 * cur_in, max_c)
        cfgs.append(LayerCfg(cur_in, cur_basic, 2, 1, True, "leaky_relu"))
    cfgs.append(LayerCfg(cur_basic, min(cur_basic * 2, max_c), 1, 2, True, "leaky_relu"))
    cfgs.append(LayerCfg(min(cur_basic * 2, max_c), out_c, 1, 1, False, activate))
    return tuple(cfgs)


def _init_conv_block_params(key, cfg):
    """Random Conv+BN params, with BN folded into the weights and the Cout dim padded."""
    kw_, kb, kg, kbeta, km, kv = jax.random.split(key, 6)
    cin, cout = cfg.cin, cfg.cout
    k = 16 * cin
    w = 0.05 * jax.random.normal(kw_, (4, 4, cin, cout), jnp.float32)   # (KH,KW,Cin,Cout)
    b = 0.01 * jax.random.normal(kb, (cout,), jnp.float32)
    if cfg.bn:
        gamma = 1.0 + 0.01 * jax.random.normal(kg, (cout,), jnp.float32)
        beta = 0.01 * jax.random.normal(kbeta, (cout,), jnp.float32)
        mean = 0.01 * jax.random.normal(km, (cout,), jnp.float32)
        var = 1.0 + 0.1 * jnp.abs(jax.random.normal(kv, (cout,), jnp.float32))
        scale = gamma / jnp.sqrt(var + 1e-5)
        shift = beta - mean * scale
    else:
        scale = jnp.ones((cout,), jnp.float32)
        shift = jnp.zeros((cout,), jnp.float32)

    # Fold BN: conv(x; W*scale) + (b*scale + shift)
    w_f = w * scale[None, None, None, :]
    c = b * scale + shift
    # (KH,KW,Cin,Cout) -> (Cout, K) with K ordered (kh, kw, cin) to match _im2col_t.
    wt = jnp.transpose(w_f, (3, 0, 1, 2)).reshape(cout, k)

    cout_p = _round_up(cout, 8)                      # clean sublane tiling / MXU feed
    wt = jnp.pad(wt, ((0, cout_p - cout), (0, 0))).astype(jnp.bfloat16)
    c = jnp.pad(c, (0, cout_p - cout)).reshape(cout_p, 1).astype(jnp.float32)
    return dict(wt=wt, c=c)


def init_multi_scale_discriminator(key, in_c, out_c, basic_c, layers_num, blocks_num,
                                   activate="sigmoid"):
    cfgs_blocks = []
    params_blocks = []
    for _ in range(blocks_num):
        cfgs = _encode_layer_cfgs(in_c, out_c, basic_c, layers_num, activate)
        layer_params = []
        for cfg in cfgs:
            key, sub = jax.random.split(key)
            layer_params.append(_init_conv_block_params(sub, cfg))
        cfgs_blocks.append(cfgs)
        params_blocks.append(layer_params)
    return tuple(cfgs_blocks), params_blocks


# ----------------------------------------------------------------------------- forward
def _to_nchw(h_cnhw):
    return jnp.transpose(h_cnhw, (1, 0, 2, 3)).astype(jnp.float32)


@functools.partial(jax.jit, static_argnums=(0, 3))
def _forward_impl(cfgs_blocks, params_blocks, x_nchw, get_feats):
    # NCHW -> channel-major CNHW; bf16 activation stream (f32 accumulate in-kernel).
    x = jnp.transpose(x_nchw, (1, 0, 2, 3)).astype(jnp.bfloat16)
    features = []
    nblocks = len(cfgs_blocks)
    for bi, (cfgs, params) in enumerate(zip(cfgs_blocks, params_blocks)):
        h = x
        feats = []
        for cfg, p in zip(cfgs, params):
            h = conv_block_forward(h, p, cfg)
            if get_feats:
                feats.append(_to_nchw(h))
        features.append(feats if get_feats else _to_nchw(h))
        if bi + 1 < nblocks:
            # (PyTorch also pools after the last block but discards the result.)
            x = avg_pool_3x3_s2_p1(x)
    return features


def multi_scale_discriminator_forward(model, x_nchw, get_feats=False):
    """Forward matching MultiScaleDiscriminator.forward.  Input/outputs are NCHW f32."""
    cfgs_blocks, params_blocks = model
    return _forward_impl(cfgs_blocks, params_blocks, x_nchw, bool(get_feats))


# ----------------------------------------------------------------------------- main
if __name__ == "__main__":
    key = jax.random.PRNGKey(0)
    k_param, k_x = jax.random.split(key)

    in_c, out_c, basic_c, layers_num, blocks_num = 4, 1, 8, 2, 2
    model = init_multi_scale_discriminator(k_param, in_c, out_c, basic_c,
                                           layers_num, blocks_num, activate="sigmoid")

    x = jax.random.normal(k_x, (2, in_c, 16, 16), jnp.float32)     # NCHW like PyTorch

    outs = multi_scale_discriminator_forward(model, x, get_feats=False)
    outs = [jax.block_until_ready(o) for o in outs]

    # sanity: sigmoid outputs finite and in [0, 1] (bf16 can saturate to exactly 0/1)
    for o in outs:
        assert o.ndim == 4 and o.shape[0] == 2 and o.shape[1] == out_c
        assert bool(jnp.all(jnp.isfinite(o)))
        assert bool(jnp.all((o >= 0.0) & (o <= 1.0)))

    print("KERNEL_OK")
</pallas_src>

<mosaic_0001>
module attributes {stable_mosaic.version = 11 : i64} {
  func.func @_avgpool_kernel(%arg0: i32, %arg1: memref<4x16x16xbf16, #tpu.memory_space<vmem>>, %arg2: memref<16x8xf32, #tpu.memory_space<vmem>>, %arg3: memref<8x16xf32, #tpu.memory_space<vmem>>, %arg4: memref<4x8x8xbf16, #tpu.memory_space<vmem>>) attributes {dimension_semantics = [#tpu.dimension_semantics<parallel>], iteration_bounds = array<i64: 2>, scalar_prefetch = 0 : i64, scratch_operands = 0 : i64, tpu.core_type = #tpu.core_type<tc>, window_params = [{transform_indices = @transform_0, window_bounds = array<i64: 4, 16, 16>}, {pipeline_mode = #tpu.pipeline_mode<synchronous>, transform_indices = @transform_1, window_bounds = array<i64: 16, 8>}, {pipeline_mode = #tpu.pipeline_mode<synchronous>, transform_indices = @transform_2, window_bounds = array<i64: 8, 16>}, {transform_indices = @transform_3, window_bounds = array<i64: 4, 8, 8>}]} {
    %c0 = arith.constant 0 : index
    %c0_0 = arith.constant 0 : index
    %0 = vector.load %arg2[%c0, %c0_0] : memref<16x8xf32, #tpu.memory_space<vmem>>, vector<16x8xf32>
    %c0_1 = arith.constant 0 : index
    %c0_2 = arith.constant 0 : index
    %1 = vector.load %arg3[%c0_1, %c0_2] : memref<8x16xf32, #tpu.memory_space<vmem>>, vector<8x16xf32>
    %c0_3 = arith.constant 0 : index
    %c0_4 = arith.constant 0 : index
    %c0_5 = arith.constant 0 : index
    %2 = vector.load %arg1[%c0_3, %c0_4, %c0_5] : memref<4x16x16xbf16, #tpu.memory_space<vmem>>, vector<1x16x16xbf16>
    %3 = vector.shape_cast %2 : vector<1x16x16xbf16> to vector<16x16xbf16>
    %4 = arith.extf %3 : vector<16x16xbf16> to vector<16x16xf32>
    %cst = arith.constant dense<0.000000e+00> : vector<16x8xf32>
    %5 = tpu.matmul %4, %0, %cst {dimension_numbers = #tpu.dot_dimension_numbers<[1], [0], [0], [1], [0, 0, 1, 1], [], []>} : vector<16x16xf32>, vector<16x8xf32>, vector<16x8xf32> -> vector<16x8xf32>
    %cst_6 = arith.constant dense<0.000000e+00> : vector<8x8xf32>
    %6 = tpu.matmul %1, %5, %cst_6 {dimension_numbers = #tpu.dot_dimension_numbers<[1], [0], [0], [1], [0, 0, 1, 1], [], []>} : vector<8x16xf32>, vector<16x8xf32>, vector<8x8xf32> -> vector<8x8xf32>
    %7 = arith.truncf %6 : vector<8x8xf32> to vector<8x8xbf16>
    %c0_7 = arith.constant 0 : index
    %c0_8 = arith.constant 0 : index
    %c0_9 = arith.constant 0 : index
    %8 = vector.load %arg4[%c0_7, %c0_8, %c0_9] : memref<4x8x8xbf16, #tpu.memory_space<vmem>>, vector<1x8x8xbf16>
    %9 = vector.shape_cast %8 : vector<1x8x8xbf16> to vector<8x8xbf16>
    %10 = vector.shape_cast %7 : vector<8x8xbf16> to vector<1x8x8xbf16>
    tpu.vector_store %arg4[%c0_7, %c0_8, %c0_9], %10 {strides = array<i32>} : memref<4x8x8xbf16, #tpu.memory_space<vmem>>, vector<1x8x8xbf16>,
    %c1 = arith.constant 1 : index
    %c0_10 = arith.constant 0 : index
    %c0_11 = arith.constant 0 : index
    %11 = vector.load %arg1[%c1, %c0_10, %c0_11] : memref<4x16x16xbf16, #tpu.memory_space<vmem>>, vector<1x16x16xbf16>
    %12 = vector.shape_cast %11 : vector<1x16x16xbf16> to vector<16x16xbf16>
    %13 = arith.extf %12 : vector<16x16xbf16> to vector<16x16xf32>
    %cst_12 = arith.constant dense<0.000000e+00> : vector<16x8xf32>
    %14 = tpu.matmul %13, %0, %cst_12 {dimension_numbers = #tpu.dot_dimension_numbers<[1], [0], [0], [1], [0, 0, 1, 1], [], []>} : vector<16x16xf32>, vector<16x8xf32>, vector<16x8xf32> -> vector<16x8xf32>
    %cst_13 = arith.constant dense<0.000000e+00> : vector<8x8xf32>
    %15 = tpu.matmul %1, %14, %cst_13 {dimension_numbers = #tpu.dot_dimension_numbers<[1], [0], [0], [1], [0, 0, 1, 1], [], []>} : vector<8x16xf32>, vector<16x8xf32>, vector<8x8xf32> -> vector<8x8xf32>
    %16 = arith.truncf %15 : vector<8x8xf32> to vector<8x8xbf16>
    %c1_14 = arith.constant 1 : index
    %c0_15 = arith.constant 0 : index
    %c0_16 = arith.constant 0 : index
    %17 = vector.load %arg4[%c1_14, %c0_15, %c0_16] : memref<4x8x8xbf16, #tpu.memory_space<vmem>>, vector<1x8x8xbf16>
    %18 = vector.shape_cast %17 : vector<1x8x8xbf16> to vector<8x8xbf16>
    %19 = vector.shape_cast %16 : vector<8x8xbf16> to vector<1x8x8xbf16>
    tpu.vector_store %arg4[%c1_14, %c0_15, %c0_16], %19 {strides = array<i32>} : memref<4x8x8xbf16, #tpu.memory_space<vmem>>, vector<1x8x8xbf16>,
    %c2 = arith.constant 2 : index
    %c0_17 = arith.constant 0 : index
    %c0_18 = arith.constant 0 : index
    %20 = vector.load %arg1[%c2, %c0_17, %c0_18] : memref<4x16x16xbf16, #tpu.memory_space<vmem>>, vector<1x16x16xbf16>
    %21 = vector.shape_cast %20 : vector<1x16x16xbf16> to vector<16x16xbf16>
    %22 = arith.extf %21 : vector<16x16xbf16> to vector<16x16xf32>
    %cst_19 = arith.constant dense<0.000000e+00> : vector<16x8xf32>
    %23 = tpu.matmul %22, %0, %cst_19 {dimension_numbers = #tpu.dot_dimension_numbers<[1], [0], [0], [1], [0, 0, 1, 1], [], []>} : vector<16x16xf32>, vector<16x8xf32>, vector<16x8xf32> -> vector<16x8xf32>
    %cst_20 = arith.constant dense<0.000000e+00> : vector<8x8xf32>
    %24 = tpu.matmul %1, %23, %cst_20 {dimension_numbers = #tpu.dot_dimension_numbers<[1], [0], [0], [1], [0, 0, 1, 1], [], []>} : vector<8x16xf32>, vector<16x8xf32>, vector<8x8xf32> -> vector<8x8xf32>
    %25 = arith.truncf %24 : vector<8x8xf32> to vector<8x8xbf16>
    %c2_21 = arith.constant 2 : index
    %c0_22 = arith.constant 0 : index
    %c0_23 = arith.constant 0 : index
    %26 = vector.load %arg4[%c2_21, %c0_22, %c0_23] : memref<4x8x8xbf16, #tpu.memory_space<vmem>>, vector<1x8x8xbf16>
    %27 = vector.shape_cast %26 : vector<1x8x8xbf16> to vector<8x8xbf16>
    %28 = vector.shape_cast %25 : vector<8x8xbf16> to vector<1x8x8xbf16>
    tpu.vector_store %arg4[%c2_21, %c0_22, %c0_23], %28 {strides = array<i32>} : memref<4x8x8xbf16, #tpu.memory_space<vmem>>, vector<1x8x8xbf16>,
    %c3 = arith.constant 3 : index
    %c0_24 = arith.constant 0 : index
    %c0_25 = arith.constant 0 : index
    %29 = vector.load %arg1[%c3, %c0_24, %c0_25] : memref<4x16x16xbf16, #tpu.memory_space<vmem>>, vector<1x16x16xbf16>
    %30 = vector.shape_cast %29 : vector<1x16x16xbf16> to vector<16x16xbf16>
    %31 = arith.extf %30 : vector<16x16xbf16> to vector<16x16xf32>
    %cst_26 = arith.constant dense<0.000000e+00> : vector<16x8xf32>
    %32 = tpu.matmul %31, %0, %cst_26 {dimension_numbers = #tpu.dot_dimension_numbers<[1], [0], [0], [1], [0, 0, 1, 1], [], []>} : vector<16x16xf32>, vector<16x8xf32>, vector<16x8xf32> -> vector<16x8xf32>
    %cst_27 = arith.constant dense<0.000000e+00> : vector<8x8xf32>
    %33 = tpu.matmul %1, %32, %cst_27 {dimension_numbers = #tpu.dot_dimension_numbers<[1], [0], [0], [1], [0, 0, 1, 1], [], []>} : vector<8x16xf32>, vector<16x8xf32>, vector<8x8xf32> -> vector<8x8xf32>
    %34 = arith.truncf %33 : vector<8x8xf32> to vector<8x8xbf16>
    %c3_28 = arith.constant 3 : index
    %c0_29 = arith.constant 0 : index
    %c0_30 = arith.constant 0 : index
    %35 = vector.load %arg4[%c3_28, %c0_29, %c0_30] : memref<4x8x8xbf16, #tpu.memory_space<vmem>>, vector<1x8x8xbf16>
    %36 = vector.shape_cast %35 : vector<1x8x8xbf16> to vector<8x8xbf16>
    %37 = vector.shape_cast %34 : vector<8x8xbf16> to vector<1x8x8xbf16>
    tpu.vector_store %arg4[%c3_28, %c0_29, %c0_30], %37 {strides = array<i32>} : memref<4x8x8xbf16, #tpu.memory_space<vmem>>, vector<1x8x8xbf16>,
    return
  }
  func.func @transform_0(%arg0: i32) -> (i32, i32, i32) {
    %c0_i32 = arith.constant 0 : i32
    %c0_i32_0 = arith.constant 0 : i32
    %c0_i32_1 = arith.constant 0 : i32
    return %arg0, %c0_i32, %c0_i32_0 : i32, i32, i32
  }
  func.func @transform_1(%arg0: i32) -> (i32, i32) {
    %c0_i32 = arith.constant 0 : i32
    %c0_i32_0 = arith.constant 0 : i32
    %c0_i32_1 = arith.constant 0 : i32
    return %c0_i32, %c0_i32_0 : i32, i32
  }
  func.func @transform_2(%arg0: i32) -> (i32, i32) {
    %c0_i32 = arith.constant 0 : i32
    %c0_i32_0 = arith.constant 0 : i32
    %c0_i32_1 = arith.constant 0 : i32
    return %c0_i32, %c0_i32_0 : i32, i32
  }
  func.func @transform_3(%arg0: i32) -> (i32, i32, i32) {
    %c0_i32 = arith.constant 0 : i32
    %c0_i32_0 = arith.constant 0 : i32
    %c0_i32_1 = arith.constant 0 : i32
    return %arg0, %c0_i32, %c0_i32_0 : i32, i32, i32
  }
}

module attributes {stable_mosaic.version = 11 : i64} {
  func.func @_conv_mm_kernel(%arg0: i32, %arg1: i32, %arg2: memref<8x64xbf16, #tpu.memory_space<vmem>>, %arg3: memref<64x128xbf16, #tpu.memory_space<vmem>>, %arg4: memref<8x1xf32, #tpu.memory_space<vmem>>, %arg5: memref<8x128xbf16, #tpu.memory_space<vmem>>, %arg6: memref<8x128xf32, #tpu.memory_space<vmem>>) attributes {dimension_semantics = [#tpu.dimension_semantics<parallel>, #tpu.dimension_semantics<arbitrary>], iteration_bounds = array<i64: 2, 1>, scalar_prefetch = 0 : i64, scratch_operands = 1 : i64, tpu.core_type = #tpu.core_type<tc>, window_params = [{transform_indices = @transform_0, window_bounds = array<i64: 8, 64>}, {transform_indices = @transform_1, window_bounds = array<i64: 64, 128>}, {pipeline_mode = #tpu.pipeline_mode<synchronous>, transform_indices = @transform_2, window_bounds = array<i64: 8, 1>}, {transform_indices = @transform_3, window_bounds = array<i64: 8, 128>}]} {
    %c0_i32 = arith.constant 0 : i32
    %0 = arith.cmpi eq, %arg1, %c0_i32 : i32
    %1 = arith.extui %0 : i1 to i32
    %c0_i32_0 = arith.constant 0 : i32
    %2 = arith.cmpi ne, %1, %c0_i32_0 : i32
    scf.if %2 {
      %cst_10 = arith.constant 0.000000e+00 : f32
      %12 = vector.broadcast %cst_10 : f32 to vector<8x128xf32>
      %c0_11 = arith.constant 0 : index
      %c0_12 = arith.constant 0 : index
      %13 = vector.load %arg6[%c0_11, %c0_12] : memref<8x128xf32, #tpu.memory_space<vmem>>, vector<8x128xf32>
      tpu.vector_store %arg6[%c0_11, %c0_12], %12 {strides = array<i32>} : memref<8x128xf32, #tpu.memory_space<vmem>>, vector<8x128xf32>,
    } else {
    }
    %c0 = arith.constant 0 : index
    %c0_1 = arith.constant 0 : index
    %3 = vector.load %arg6[%c0, %c0_1] : memref<8x128xf32, #tpu.memory_space<vmem>>, vector<8x128xf32>
    %c0_2 = arith.constant 0 : index
    %c0_3 = arith.constant 0 : index
    %4 = vector.load %arg2[%c0_2, %c0_3] : memref<8x64xbf16, #tpu.memory_space<vmem>>, vector<8x64xbf16>
    %c0_4 = arith.constant 0 : index
    %c0_5 = arith.constant 0 : index
    %5 = vector.load %arg3[%c0_4, %c0_5] : memref<64x128xbf16, #tpu.memory_space<vmem>>, vector<64x128xbf16>
    %cst = arith.constant dense<0.000000e+00> : vector<8x128xf32>
    %6 = tpu.matmul %4, %5, %cst {dimension_numbers = #tpu.dot_dimension_numbers<[1], [0], [0], [1], [0, 0, 1, 1], [], []>} : vector<8x64xbf16>, vector<64x128xbf16>, vector<8x128xf32> -> vector<8x128xf32>
    %7 = arith.addf %3, %6 : vector<8x128xf32>
    %c0_6 = arith.constant 0 : index
    %c0_7 = arith.constant 0 : index
    %8 = vector.load %arg6[%c0_6, %c0_7] : memref<8x128xf32, #tpu.memory_space<vmem>>, vector<8x128xf32>
    tpu.vector_store %arg6[%c0_6, %c0_7], %7 {strides = array<i32>} : memref<8x128xf32, #tpu.memory_space<vmem>>, vector<8x128xf32>,
    %c0_i32_8 = arith.constant 0 : i32
    %9 = arith.cmpi eq, %arg1, %c0_i32_8 : i32
    %10 = arith.extui %9 : i1 to i32
    %c0_i32_9 = arith.constant 0 : i32
    %11 = arith.cmpi ne, %10, %c0_i32_9 : i32
    scf.if %11 {
      %c0_10 = arith.constant 0 : index
      %c0_11 = arith.constant 0 : index
      %12 = vector.load %arg6[%c0_10, %c0_11] : memref<8x128xf32, #tpu.memory_space<vmem>>, vector<8x128xf32>
      %c0_12 = arith.constant 0 : index
      %c0_13 = arith.constant 0 : index
      %13 = vector.load %arg4[%c0_12, %c0_13] : memref<8x1xf32, #tpu.memory_space<vmem>>, vector<8x1xf32>
      %14 = vector.broadcast %13 : vector<8x1xf32> to vector<8x128xf32>
      %15 = arith.addf %12, %14 : vector<8x128xf32>
      %cst_14 = arith.constant 0.000000e+00 : f32
      %16 = vector.broadcast %cst_14 : f32 to vector<8x128xf32>
      %17 = arith.cmpf ogt, %15, %16 : vector<8x128xf32>
      %cst_15 = arith.constant 2.000000e-01 : f32
      %18 = vector.broadcast %cst_15 : f32 to vector<8x128xf32>
      %19 = arith.mulf %18, %15 : vector<8x128xf32>
      %20 = arith.select %17, %15, %19 : vector<8x128xi1>, vector<8x128xf32>
      %21 = arith.truncf %20 : vector<8x128xf32> to vector<8x128xbf16>
      %c0_16 = arith.constant 0 : index
      %c0_17 = arith.constant 0 : index
      %22 = vector.load %arg5[%c0_16, %c0_17] : memref<8x128xbf16, #tpu.memory_space<vmem>>, vector<8x128xbf16>
      tpu.vector_store %arg5[%c0_16, %c0_17], %21 {strides = array<i32>} : memref<8x128xbf16, #tpu.memory_space<vmem>>, vector<8x128xbf16>,
    } else {
    }
    return
  }
  func.func @transform_0(%arg0: i32, %arg1: i32) -> (i32, i32) {
    %c0_i32 = arith.constant 0 : i32
    %c0_i32_0 = arith.constant 0 : i32
    return %c0_i32, %arg1 : i32, i32
  }
  func.func @transform_1(%arg0: i32, %arg1: i32) -> (i32, i32) {
    %c0_i32 = arith.constant 0 : i32
    return %arg1, %arg0 : i32, i32
  }
  func.func @transform_2(%arg0: i32, %arg1: i32) -> (i32, i32) {
    %c0_i32 = arith.constant 0 : i32
    %c0_i32_0 = arith.constant 0 : i32
    %c0_i32_1 = arith.constant 0 : i32
    return %c0_i32, %c0_i32_0 : i32, i32
  }
  func.func @transform_3(%arg0: i32, %arg1: i32) -> (i32, i32) {
    %c0_i32 = arith.constant 0 : i32
    %c0_i32_0 = arith.constant 0 : i32
    return %c0_i32, %arg0 : i32, i32
  }
}

module attributes {stable_mosaic.version = 11 : i64} {
  func.func @_conv_mm_kernel(%arg0: i32, %arg1: i32, %arg2: memref<16x128xbf16, #tpu.memory_space<vmem>>, %arg3: memref<128x128xbf16, #tpu.memory_space<vmem>>, %arg4: memref<16x1xf32, #tpu.memory_space<vmem>>, %arg5: memref<16x128xbf16, #tpu.memory_space<vmem>>, %arg6: memref<16x128xf32, #tpu.memory_space<vmem>>) attributes {dimension_semantics = [#tpu.dimension_semantics<parallel>, #tpu.dimension_semantics<arbitrary>], iteration_bounds = array<i64: 2, 1>, scalar_prefetch = 0 : i64, scratch_operands = 1 : i64, tpu.core_type = #tpu.core_type<tc>, window_params = [{transform_indices = @transform_0, window_bounds = array<i64: 16, 128>}, {transform_indices = @transform_1, window_bounds = array<i64: 128, 128>}, {pipeline_mode = #tpu.pipeline_mode<synchronous>, transform_indices = @transform_2, window_bounds = array<i64: 16, 1>}, {transform_indices = @transform_3, window_bounds = array<i64: 16, 128>}]} {
    %c0_i32 = arith.constant 0 : i32
    %0 = arith.cmpi eq, %arg1, %c0_i32 : i32
    %1 = arith.extui %0 : i1 to i32
    %c0_i32_0 = arith.constant 0 : i32
    %2 = arith.cmpi ne, %1, %c0_i32_0 : i32
    scf.if %2 {
      %cst_10 = arith.constant 0.000000e+00 : f32
      %12 = vector.broadcast %cst_10 : f32 to vector<16x128xf32>
      %c0_11 = arith.constant 0 : index
      %c0_12 = arith.constant 0 : index
      %13 = vector.load %arg6[%c0_11, %c0_12] : memref<16x128xf32, #tpu.memory_space<vmem>>, vector<16x128xf32>
      tpu.vector_store %arg6[%c0_11, %c0_12], %12 {strides = array<i32>} : memref<16x128xf32, #tpu.memory_space<vmem>>, vector<16x128xf32>,
    } else {
    }
    %c0 = arith.constant 0 : index
    %c0_1 = arith.constant 0 : index
    %3 = vector.load %arg6[%c0, %c0_1] : memref<16x128xf32, #tpu.memory_space<vmem>>, vector<16x128xf32>
    %c0_2 = arith.constant 0 : index
    %c0_3 = arith.constant 0 : index
    %4 = vector.load %arg2[%c0_2, %c0_3] : memref<16x128xbf16, #tpu.memory_space<vmem>>, vector<16x128xbf16>
    %c0_4 = arith.constant 0 : index
    %c0_5 = arith.constant 0 : index
    %5 = vector.load %arg3[%c0_4, %c0_5] : memref<128x128xbf16, #tpu.memory_space<vmem>>, vector<128x128xbf16>
    %cst = arith.constant dense<0.000000e+00> : vector<16x128xf32>
    %6 = tpu.matmul %4, %5, %cst {dimension_numbers = #tpu.dot_dimension_numbers<[1], [0], [0], [1], [0, 0, 1, 1], [], []>} : vector<16x128xbf16>, vector<128x128xbf16>, vector<16x128xf32> -> vector<16x128xf32>
    %7 = arith.addf %3, %6 : vector<16x128xf32>
    %c0_6 = arith.constant 0 : index
    %c0_7 = arith.constant 0 : index
    %8 = vector.load %arg6[%c0_6, %c0_7] : memref<16x128xf32, #tpu.memory_space<vmem>>, vector<16x128xf32>
    tpu.vector_store %arg6[%c0_6, %c0_7], %7 {strides = array<i32>} : memref<16x128xf32, #tpu.memory_space<vmem>>, vector<16x128xf32>,
    %c0_i32_8 = arith.constant 0 : i32
    %9 = arith.cmpi eq, %arg1, %c0_i32_8 : i32
    %10 = arith.extui %9 : i1 to i32
    %c0_i32_9 = arith.constant 0 : i32
    %11 = arith.cmpi ne, %10, %c0_i32_9 : i32
    scf.if %11 {
      %c0_10 = arith.constant 0 : index
      %c0_11 = arith.constant 0 : index
      %12 = vector.load %arg6[%c0_10, %c0_11] : memref<16x128xf32, #tpu.memory_space<vmem>>, vector<16x128xf32>
      %c0_12 = arith.constant 0 : index
      %c0_13 = arith.constant 0 : index
      %13 = vector.load %arg4[%c0_12, %c0_13] : memref<16x1xf32, #tpu.memory_space<vmem>>, vector<16x1xf32>
      %14 = vector.broadcast %13 : vector<16x1xf32> to vector<16x128xf32>
      %15 = arith.addf %12, %14 : vector<16x128xf32>
      %cst_14 = arith.constant 0.000000e+00 : f32
      %16 = vector.broadcast %cst_14 : f32 to vector<16x128xf32>
      %17 = arith.cmpf ogt, %15, %16 : vector<16x128xf32>
      %cst_15 = arith.constant 2.000000e-01 : f32
      %18 = vector.broadcast %cst_15 : f32 to vector<16x128xf32>
      %19 = arith.mulf %18, %15 : vector<16x128xf32>
      %20 = arith.select %17, %15, %19 : vector<16x128xi1>, vector<16x128xf32>
      %21 = arith.truncf %20 : vector<16x128xf32> to vector<16x128xbf16>
      %c0_16 = arith.constant 0 : index
      %c0_17 = arith.constant 0 : index
      %22 = vector.load %arg5[%c0_16, %c0_17] : memref<16x128xbf16, #tpu.memory_space<vmem>>, vector<16x128xbf16>
      tpu.vector_store %arg5[%c0_16, %c0_17], %21 {strides = array<i32>} : memref<16x128xbf16, #tpu.memory_space<vmem>>, vector<16x128xbf16>,
    } else {
    }
    return
  }
  func.func @transform_0(%arg0: i32, %arg1: i32) -> (i32, i32) {
    %c0_i32 = arith.constant 0 : i32
    %c0_i32_0 = arith.constant 0 : i32
    return %c0_i32, %arg1 : i32, i32
  }
  func.func @transform_1(%arg0: i32, %arg1: i32) -> (i32, i32) {
    %c0_i32 = arith.constant 0 : i32
    return %arg1, %arg0 : i32, i32
  }
  func.func @transform_2(%arg0: i32, %arg1: i32) -> (i32, i32) {
    %c0_i32 = arith.constant 0 : i32
    %c0_i32_0 = arith.constant 0 : i32
    %c0_i32_1 = arith.constant 0 : i32
    return %c0_i32, %c0_i32_0 : i32, i32
  }
  func.func @transform_3(%arg0: i32, %arg1: i32) -> (i32, i32) {
    %c0_i32 = arith.constant 0 : i32
    %c0_i32_0 = arith.constant 0 : i32
    return %c0_i32, %arg0 : i32, i32
  }
}

module attributes {stable_mosaic.version = 11 : i64} {
  func.func @_conv_mm_kernel(%arg0: i32, %arg1: i32, %arg2: memref<32x256xbf16, #tpu.memory_space<vmem>>, %arg3: memref<256x128xbf16, #tpu.memory_space<vmem>>, %arg4: memref<32x1xf32, #tpu.memory_space<vmem>>, %arg5: memref<32x128xbf16, #tpu.memory_space<vmem>>, %arg6: memref<32x128xf32, #tpu.memory_space<vmem>>) attributes {dimension_semantics = [#tpu.dimension_semantics<parallel>, #tpu.dimension_semantics<arbitrary>], iteration_bounds = array<i64: 2, 1>, scalar_prefetch = 0 : i64, scratch_operands = 1 : i64, tpu.core_type = #tpu.core_type<tc>, window_params = [{transform_indices = @transform_0, window_bounds = array<i64: 32, 256>}, {transform_indices = @transform_1, window_bounds = array<i64: 256, 128>}, {pipeline_mode = #tpu.pipeline_mode<synchronous>, transform_indices = @transform_2, window_bounds = array<i64: 32, 1>}, {transform_indices = @transform_3, window_bounds = array<i64: 32, 128>}]} {
    %c0_i32 = arith.constant 0 : i32
    %0 = arith.cmpi eq, %arg1, %c0_i32 : i32
    %1 = arith.extui %0 : i1 to i32
    %c0_i32_0 = arith.constant 0 : i32
    %2 = arith.cmpi ne, %1, %c0_i32_0 : i32
    scf.if %2 {
      %cst_10 = arith.constant 0.000000e+00 : f32
      %12 = vector.broadcast %cst_10 : f32 to vector<32x128xf32>
      %c0_11 = arith.constant 0 : index
      %c0_12 = arith.constant 0 : index
      %13 = vector.load %arg6[%c0_11, %c0_12] : memref<32x128xf32, #tpu.memory_space<vmem>>, vector<32x128xf32>
      tpu.vector_store %arg6[%c0_11, %c0_12], %12 {strides = array<i32>} : memref<32x128xf32, #tpu.memory_space<vmem>>, vector<32x128xf32>,
    } else {
    }
    %c0 = arith.constant 0 : index
    %c0_1 = arith.constant 0 : index
    %3 = vector.load %arg6[%c0, %c0_1] : memref<32x128xf32, #tpu.memory_space<vmem>>, vector<32x128xf32>
    %c0_2 = arith.constant 0 : index
    %c0_3 = arith.constant 0 : index
    %4 = vector.load %arg2[%c0_2, %c0_3] : memref<32x256xbf16, #tpu.memory_space<vmem>>, vector<32x256xbf16>
    %c0_4 = arith.constant 0 : index
    %c0_5 = arith.constant 0 : index
    %5 = vector.load %arg3[%c0_4, %c0_5] : memref<256x128xbf16, #tpu.memory_space<vmem>>, vector<256x128xbf16>
    %cst = arith.constant dense<0.000000e+00> : vector<32x128xf32>
    %6 = tpu.matmul %4, %5, %cst {dimension_numbers = #tpu.dot_dimension_numbers<[1], [0], [0], [1], [0, 0, 1, 1], [], []>} : vector<32x256xbf16>, vector<256x128xbf16>, vector<32x128xf32> -> vector<32x128xf32>
    %7 = arith.addf %3, %6 : vector<32x128xf32>
    %c0_6 = arith.constant 0 : index
    %c0_7 = arith.constant 0 : index
    %8 = vector.load %arg6[%c0_6, %c0_7] : memref<32x128xf32, #tpu.memory_space<vmem>>, vector<32x128xf32>
    tpu.vector_store %arg6[%c0_6, %c0_7], %7 {strides = array<i32>} : memref<32x128xf32, #tpu.memory_space<vmem>>, vector<32x128xf32>,
    %c0_i32_8 = arith.constant 0 : i32
    %9 = arith.cmpi eq, %arg1, %c0_i32_8 : i32
    %10 = arith.extui %9 : i1 to i32
    %c0_i32_9 = arith.constant 0 : i32
    %11 = arith.cmpi ne, %10, %c0_i32_9 : i32
    scf.if %11 {
      %c0_10 = arith.constant 0 : index
      %c0_11 = arith.constant 0 : index
      %12 = vector.load %arg6[%c0_10, %c0_11] : memref<32x128xf32, #tpu.memory_space<vmem>>, vector<32x128xf32>
      %c0_12 = arith.constant 0 : index
      %c0_13 = arith.constant 0 : index
      %13 = vector.load %arg4[%c0_12, %c0_13] : memref<32x1xf32, #tpu.memory_space<vmem>>, vector<32x1xf32>
      %14 = vector.broadcast %13 : vector<32x1xf32> to vector<32x128xf32>
      %15 = arith.addf %12, %14 : vector<32x128xf32>
      %cst_14 = arith.constant 0.000000e+00 : f32
      %16 = vector.broadcast %cst_14 : f32 to vector<32x128xf32>
      %17 = arith.cmpf ogt, %15, %16 : vector<32x128xf32>
      %cst_15 = arith.constant 2.000000e-01 : f32
      %18 = vector.broadcast %cst_15 : f32 to vector<32x128xf32>
      %19 = arith.mulf %18, %15 : vector<32x128xf32>
      %20 = arith.select %17, %15, %19 : vector<32x128xi1>, vector<32x128xf32>
      %21 = arith.truncf %20 : vector<32x128xf32> to vector<32x128xbf16>
      %c0_16 = arith.constant 0 : index
      %c0_17 = arith.constant 0 : index
      %22 = vector.load %arg5[%c0_16, %c0_17] : memref<32x128xbf16, #tpu.memory_space<vmem>>, vector<32x128xbf16>
      tpu.vector_store %arg5[%c0_16, %c0_17], %21 {strides = array<i32>} : memref<32x128xbf16, #tpu.memory_space<vmem>>, vector<32x128xbf16>,
    } else {
    }
    return
  }
  func.func @transform_0(%arg0: i32, %arg1: i32) -> (i32, i32) {
    %c0_i32 = arith.constant 0 : i32
    %c0_i32_0 = arith.constant 0 : i32
    return %c0_i32, %arg1 : i32, i32
  }
  func.func @transform_1(%arg0: i32, %arg1: i32) -> (i32, i32) {
    %c0_i32 = arith.constant 0 : i32
    return %arg1, %arg0 : i32, i32
  }
  func.func @transform_2(%arg0: i32, %arg1: i32) -> (i32, i32) {
    %c0_i32 = arith.constant 0 : i32
    %c0_i32_0 = arith.constant 0 : i32
    %c0_i32_1 = arith.constant 0 : i32
    return %c0_i32, %c0_i32_0 : i32, i32
  }
  func.func @transform_3(%arg0: i32, %arg1: i32) -> (i32, i32) {
    %c0_i32 = arith.constant 0 : i32
    %c0_i32_0 = arith.constant 0 : i32
    return %c0_i32, %arg0 : i32, i32
  }
}

module attributes {stable_mosaic.version = 11 : i64} {
  func.func @_conv_mm_kernel(%arg0: i32, %arg1: i32, %arg2: memref<8x512xbf16, #tpu.memory_space<vmem>>, %arg3: memref<512x128xbf16, #tpu.memory_space<vmem>>, %arg4: memref<8x1xf32, #tpu.memory_space<vmem>>, %arg5: memref<8x128xbf16, #tpu.memory_space<vmem>>, %arg6: memref<8x128xf32, #tpu.memory_space<vmem>>) attributes {dimension_semantics = [#tpu.dimension_semantics<parallel>, #tpu.dimension_semantics<arbitrary>], iteration_bounds = array<i64: 2, 1>, scalar_prefetch = 0 : i64, scratch_operands = 1 : i64, tpu.core_type = #tpu.core_type<tc>, window_params = [{transform_indices = @transform_0, window_bounds = array<i64: 8, 512>}, {transform_indices = @transform_1, window_bounds = array<i64: 512, 128>}, {pipeline_mode = #tpu.pipeline_mode<synchronous>, transform_indices = @transform_2, window_bounds = array<i64: 8, 1>}, {transform_indices = @transform_3, window_bounds = array<i64: 8, 128>}]} {
    %c0_i32 = arith.constant 0 : i32
    %0 = arith.cmpi eq, %arg1, %c0_i32 : i32
    %1 = arith.extui %0 : i1 to i32
    %c0_i32_0 = arith.constant 0 : i32
    %2 = arith.cmpi ne, %1, %c0_i32_0 : i32
    scf.if %2 {
      %cst_10 = arith.constant 0.000000e+00 : f32
      %12 = vector.broadcast %cst_10 : f32 to vector<8x128xf32>
      %c0_11 = arith.constant 0 : index
      %c0_12 = arith.constant 0 : index
      %13 = vector.load %arg6[%c0_11, %c0_12] : memref<8x128xf32, #tpu.memory_space<vmem>>, vector<8x128xf32>
      tpu.vector_store %arg6[%c0_11, %c0_12], %12 {strides = array<i32>} : memref<8x128xf32, #tpu.memory_space<vmem>>, vector<8x128xf32>,
    } else {
    }
    %c0 = arith.constant 0 : index
    %c0_1 = arith.constant 0 : index
    %3 = vector.load %arg6[%c0, %c0_1] : memref<8x128xf32, #tpu.memory_space<vmem>>, vector<8x128xf32>
    %c0_2 = arith.constant 0 : index
    %c0_3 = arith.constant 0 : index
    %4 = vector.load %arg2[%c0_2, %c0_3] : memref<8x512xbf16, #tpu.memory_space<vmem>>, vector<8x512xbf16>
    %c0_4 = arith.constant 0 : index
    %c0_5 = arith.constant 0 : index
    %5 = vector.load %arg3[%c0_4, %c0_5] : memref<512x128xbf16, #tpu.memory_space<vmem>>, vector<512x128xbf16>
    %cst = arith.constant dense<0.000000e+00> : vector<8x128xf32>
    %6 = tpu.matmul %4, %5, %cst {dimension_numbers = #tpu.dot_dimension_numbers<[1], [0], [0], [1], [0, 0, 1, 1], [], []>} : vector<8x512xbf16>, vector<512x128xbf16>, vector<8x128xf32> -> vector<8x128xf32>
    %7 = arith.addf %3, %6 : vector<8x128xf32>
    %c0_6 = arith.constant 0 : index
    %c0_7 = arith.constant 0 : index
    %8 = vector.load %arg6[%c0_6, %c0_7] : memref<8x128xf32, #tpu.memory_space<vmem>>, vector<8x128xf32>
    tpu.vector_store %arg6[%c0_6, %c0_7], %7 {strides = array<i32>} : memref<8x128xf32, #tpu.memory_space<vmem>>, vector<8x128xf32>,
    %c0_i32_8 = arith.constant 0 : i32
    %9 = arith.cmpi eq, %arg1, %c0_i32_8 : i32
    %10 = arith.extui %9 : i1 to i32
    %c0_i32_9 = arith.constant 0 : i32
    %11 = arith.cmpi ne, %10, %c0_i32_9 : i32
    scf.if %11 {
      %c0_10 = arith.constant 0 : index
      %c0_11 = arith.constant 0 : index
      %12 = vector.load %arg6[%c0_10, %c0_11] : memref<8x128xf32, #tpu.memory_space<vmem>>, vector<8x128xf32>
      %c0_12 = arith.constant 0 : index
      %c0_13 = arith.constant 0 : index
      %13 = vector.load %arg4[%c0_12, %c0_13] : memref<8x1xf32, #tpu.memory_space<vmem>>, vector<8x1xf32>
      %14 = vector.broadcast %13 : vector<8x1xf32> to vector<8x128xf32>
      %15 = arith.addf %12, %14 : vector<8x128xf32>
      %16 = arith.negf %15 : vector<8x128xf32>
      %17 = math.exp %16 : vector<8x128xf32>
      %cst_14 = arith.constant 1.000000e+00 : f32
      %18 = vector.broadcast %cst_14 : f32 to vector<8x128xf32>
      %19 = arith.addf %18, %17 : vector<8x128xf32>
      %20 = arith.divf %18, %19 : vector<8x128xf32>
      %21 = arith.truncf %20 : vector<8x128xf32> to vector<8x128xbf16>
      %c0_15 = arith.constant 0 : index
      %c0_16 = arith.constant 0 : index
      %22 = vector.load %arg5[%c0_15, %c0_16] : memref<8x128xbf16, #tpu.memory_space<vmem>>, vector<8x128xbf16>
      tpu.vector_store %arg5[%c0_15, %c0_16], %21 {strides = array<i32>} : memref<8x128xbf16, #tpu.memory_space<vmem>>, vector<8x128xbf16>,
    } else {
    }
    return
  }
  func.func @transform_0(%arg0: i32, %arg1: i32) -> (i32, i32) {
    %c0_i32 = arith.constant 0 : i32
    %c0_i32_0 = arith.constant 0 : i32
    return %c0_i32, %arg1 : i32, i32
  }
  func.func @transform_1(%arg0: i32, %arg1: i32) -> (i32, i32) {
    %c0_i32 = arith.constant 0 : i32
    return %arg1, %arg0 : i32, i32
  }
  func.func @transform_2(%arg0: i32, %arg1: i32) -> (i32, i32) {
    %c0_i32 = arith.constant 0 : i32
    %c0_i32_0 = arith.constant 0 : i32
    %c0_i32_1 = arith.constant 0 : i32
    return %c0_i32, %c0_i32_0 : i32, i32
  }
  func.func @transform_3(%arg0: i32, %arg1: i32) -> (i32, i32) {
    %c0_i32 = arith.constant 0 : i32
    %c0_i32_0 = arith.constant 0 : i32
    return %c0_i32, %arg0 : i32, i32
  }
}

</mosaic_0001>

<bundles_post_ra>
// kernel: _forward_impl.13
= control target key start
LH: loop header
LB: loop body
LE: loop exit
PB: predicated region body
PF: predicated region fallthrough
CT: control target
= control target key end

     0   :  { %s1082_s12 = smov 0   ;;  %s1128_s0 = inlined_call_operand.vmem [shape: bf16[8,16,16], index: 0, kind: input, shape index: {}]   ;;  %s1129_s1 = inlined_call_operand.vmem [shape: f32[16,8], index: 1, kind: input, shape index: {}]   ;;  %s1130_s2 = inlined_call_operand.vmem [shape: f32[8,16], index: 2, kind: input, shape index: {}]   ;;  %s1131_s3 = inlined_call_operand.vmem [shape: bf16[8,8,8], index: 3, kind: output, shape index: {}]  }
   0x1 LB: > { %s875_s13 = sadd.s32 4294967295, %s1057_s12   ;;  %p879_p0 = scmp.ge.s32.totalorder %s1057_s12, 1  ;;  %s1057_s12 = sphi %s1082_s12, %s13_s12  }
   0x2   : > { %p139_p1 = scmp.lt.s32.totalorder %s1057_s12, 3 }
   0x4   : > { %p140_p2 = pnand %p879_p0, %p139_p1 }
   0x5   : > { %v177_v0 = vld [vmem:[%s1129_s1] sm:$0xff] (!%p140_p2)  ;;  %v178_v1 = vld [vmem:[%s1129_s1 + $0x8] sm:$0xff] (!%p140_p2)  ;;  %s880_s18 = sshll.u32 (!%p140_p2), %s875_s13, 2  ;;  %vm184_vm0 = vcmask (!%p140_p2), 130048   ;;  %v1059_v15 = vmov (!%p140_p2), 0.0|0.0   ;;  %vm1060_vm1 = vmmov (!%p140_p2), 0  }
   0x6   : > { %143 = sbr.rel (%p140_p2) target bundleno = 465 (0x1d1), region = 32  ;;  %v1012_v2 = vpack.c.bf16 (!%p140_p2), %v178_v1, %v177_v0  ;;  %p165_p3 = scmp.lt.s32.totalorder (!%p140_p2), %s880_s18, 7  ;;  %1016 = vmatprep.subr.bf16.mxu1 (!%p140_p2), %v1059_v15  ;;  %v1061_v16 = vmov (!%p140_p2), 0.0   ;;  %v179_v21 = vld [vmem:[%s1130_s2] sm:$0xff] (!%p140_p2)  ;;  %vm340_vm2 = vcmask (!%p140_p2), 60416  }
   0x7   : > { %967 = vmatprep.mubr.msk.f32.mxu1 (!%p140_p2), %vm1060_vm1, %v1061_v16 }
   0x8   : > { %1013 = vmatprep.subr.bf16.mxu0 (!%p140_p2), %v1012_v2 }
   0x9   : > { %1015 = vmatpush3.bf16.msra.mxu0 (!%p140_p2), %v1012_v2 }
   0xa   : > { %1020 = vmatprep.subr.bf16.mxu0 (!%p140_p2), %v1012_v2 }
   0xd   : > { %s1133_s18 = smov (!%p165_p3, %s880_s18), 7 }
   0xe   : > { %s908_s19 = sshll.u32 %s1133_s18, 3  ;;  %s884_s25 = sshll.u32 %s1133_s18, 2 }
   0xf   : > { %s169_s22 = scalar_lea.vmem %s1128_s0, %s908_s19  ;;  %s175_s28 = scalar_lea.vmem %s1131_s3, %s884_s25 }
  0x10   : > { %v910_v3 = vld [vmem:[%s169_s22] sm:$0xff]   ;;  %v925_v4 = vld [vmem:[%s169_s22 + $0x8] sm:$0xff]   ;;  %v926_v8 = vld [vmem:[%s169_s22 + $0x10] sm:$0xff]  }
  0x11   : > { %v911_v5 = vunpack.c.l.bf16 %v910_v3  ;;  %v912_v6 = vunpack.c.h.bf16 %v910_v3  ;;  %v915_v7 = vunpack.c.l.bf16 %v925_v4  ;;  %v916_v9 = vunpack.c.h.bf16 %v925_v4  ;;  %v927_v11 = vld [vmem:[%s169_s22 + $0x18] sm:$0xff]  }
  0x12   : > { %v919_v10 = vunpack.c.l.bf16 %v926_v8  ;;  %v920_v12 = vunpack.c.h.bf16 %v926_v8  ;;  %v923_v13 = vunpack.c.l.bf16 %v927_v11  ;;  %v924_v14 = vunpack.c.h.bf16 %v927_v11 }
  0x13   : > { %960 = vmatprep.mubr.msk.f32.mxu0 %vm184_vm0, %v911_v5 }
  0x14   : > { %961 = vmatmul.mubr.msk.f32.vlgmr.msra.gmra.mrb[0].mxu0 %vm184_vm0, %v912_v6 }
  0x15   : > { %1022 = vmatpush3.bf16.msra.mxu0 %v1012_v2  ;;  %974 = vmatprep.mubr.msk.f32.mxu0 %vm184_vm0, %v915_v7 }
  0x16   : > { %1027 = vmatprep.subr.bf16.mxu0 %v1012_v2 }
  0x18   : > { %975 = vmatmul.mubr.msk.f32.vlgmr.msra.gmra.mrb[2].mxu0 %vm184_vm0, %v916_v9 }
  0x19   : > { %1029 = vmatpush3.bf16.msra.mxu0 %v1012_v2  ;;  %988 = vmatprep.mubr.msk.f32.mxu0 %vm184_vm0, %v919_v10 }
  0x1a   : > { %1034 = vmatprep.subr.bf16.mxu0 %v1012_v2 }
  0x1c   : > { %989 = vmatmul.mubr.msk.f32.vlgmr.msra.gmra.mrb[4].mxu0 %vm184_vm0, %v920_v12 }
  0x1d   : > { %1036 = vmatpush3.bf16.msra.mxu0 %v1012_v2  ;;  %1002 = vmatprep.mubr.msk.f32.mxu0 %vm184_vm0, %v923_v13 }
  0x20   : > { %1003 = vmatmul.mubr.msk.f32.vlgmr.msra.gmra.mrb[6].mxu0 %vm184_vm0, %v924_v14 }
  0xe7   : > { %v962_v17 = vpop.f32.mrb[0].mxu0 }
  0xe8   : > { %v257_v18 = vpop.f32.mrb[1].mxu0 }
  0xe9   : > { %v1017_v19 = vpack.c.bf16 %v962_v17, %v257_v18 }
  0xeb   : > { %1018 = vmatpush3.bf16.msra.mxu1 %v1017_v19  ;;  %v976_v20 = vpop.f32.mrb[2].mxu0 }
  0xec   : > { %v419_v22 = vpop.f32.mrb[3].mxu0  ;;  %1023 = vmatprep.subr.bf16.mxu1 %v1059_v15 }
  0xed   : > { %v1024_v23 = vpack.c.bf16 %v976_v20, %v419_v22 }
  0xee   : > { %968 = vmatmul.mubr.msk.f32.vlgmr.msra.gmra.mrb[0].mxu1 %vm184_vm0, %v179_v21 }
  0xef   : > { %1025 = vmatpush3.bf16.msra.mxu1 %v1024_v23  ;;  %v990_v24 = vpop.f32.mrb[4].mxu0  ;;  %981 = vmatprep.mubr.msk.f32.mxu1 %vm1060_vm1, %v1061_v16 }
  0xf0   : > { %v578_v25 = vpop.f32.mrb[5].mxu0  ;;  %1030 = vmatprep.subr.bf16.mxu1 %v1059_v15 }
  0xf1   : > { %v1031_v26 = vpack.c.bf16 %v990_v24, %v578_v25 }
  0xf2   : > { %982 = vmatmul.mubr.msk.f32.vlgmr.msra.gmra.mrb[2].mxu1 %vm184_vm0, %v179_v21 }
  0xf3   : > { %1032 = vmatpush3.bf16.msra.mxu1 %v1031_v26  ;;  %v1004_v27 = vpop.f32.mrb[6].mxu0  ;;  %995 = vmatprep.mubr.msk.f32.mxu1 %vm1060_vm1, %v1061_v16 }
  0xf4   : > { %v737_v28 = vpop.f32.mrb[7].mxu0  ;;  %1037 = vmatprep.subr.bf16.mxu1 %v1059_v15 }
  0xf5   : > { %v1038_v29 = vpack.c.bf16 %v1004_v27, %v737_v28 }
  0xf6   : > { %996 = vmatmul.mubr.msk.f32.vlgmr.msra.gmra.mrb[4].mxu1 %vm184_vm0, %v179_v21 }
  0xf7   : > { %1039 = vmatpush3.bf16.msra.mxu1 %v1038_v29  ;;  %1009 = vmatprep.mubr.msk.f32.mxu1 %vm1060_vm1, %v1061_v16 }
  0xfa   : > { %1010 = vmatmul.mubr.msk.f32.vlgmr.msra.gmra.mrb[6].mxu1 %vm184_vm0, %v179_v21 }
 0x1c1   : > { %v335_v30 = vpop.f32.mrb[0].mxu1 }
 0x1c2   : > { %v339_v31 = vpack.c.bf16 %v335_v30, %v335_v30  ;;  %v969_v32 = vpop.f32.mrb[1].mxu1 }
 0x1c4   : > { %341 = vst.msk [vmem:[%s175_s28] sm:$0xf] %vm340_vm2, %v339_v31 }
 0x1c5   : > { %v494_v33 = vpop.f32.mrb[2].mxu1 }
 0x1c6   : > { %v498_v34 = vpack.c.bf16 %v494_v33, %v494_v33  ;;  %v983_v35 = vpop.f32.mrb[3].mxu1 }
 0x1c8   : > { %893 = vst.msk [vmem:[%s175_s28 + $0x4] sm:$0xf] %vm340_vm2, %v498_v34 }
 0x1c9   : > { %v653_v36 = vpop.f32.mrb[4].mxu1 }
 0x1ca   : > { %v657_v37 = vpack.c.bf16 %v653_v36, %v653_v36  ;;  %v997_v38 = vpop.f32.mrb[5].mxu1 }
 0x1cc   : > { %899 = vst.msk [vmem:[%s175_s28 + $0x8] sm:$0xf] %vm340_vm2, %v657_v37 }
 0x1cd   : > { %v812_v39 = vpop.f32.mrb[6].mxu1 }
 0x1ce   : > { %v816_v40 = vpack.c.bf16 %v812_v39, %v812_v39  ;;  %v1011_v41 = vpop.f32.mrb[7].mxu1 }
 0x1d0   : > { %905 = vst.msk [vmem:[%s175_s28 + $0xc] sm:$0xf] %vm340_vm2, %v816_v40 }
 0x1d1 PF: > { %s13_s12 = sadd.s32 1, %s1057_s12  }
 0x1d2   : > { %p10_p4 = scmp.ge.s32.totalorder %s13_s12, 4  }
 0x1d4   :  { %12 = sbr.rel (!%p10_p4) target bundleno = 1 (0x1), region = 68 }

// kernel: _forward_impl.14
= control target key start
LH: loop header
LB: loop body
LE: loop exit
PB: predicated region body
PF: predicated region fallthrough
CT: control target
= control target key end

     0   :  { %s605_s12 = smov 0   ;;  %s607_s13 = smov 0   ;;  %s677_s0 = inlined_call_operand.vmem [shape: bf16[8,64], index: 0, kind: input, shape index: {}]   ;;  %s678_s1 = inlined_call_operand.vmem [shape: bf16[64,256], index: 1, kind: input, shape index: {}]   ;;  %s679_s2 = inlined_call_operand.vmem [shape: f32[8,1], index: 2, kind: input, shape index: {}]   ;;  %s680_s3 = inlined_call_operand.vmem [shape: bf16[8,256], index: 3, kind: output, shape index: {}]  }
   0x1   :  { %s609_s14 = smov 0   ;;  %s611_s15 = smov 0  }
   0x2   :  { %s613_s16 = smov 0  }
   0x3 LB: > { %s25_s17 = sadd.s32 1, %s576_s15  ;;  %p67_p1 = scmp.ne.s32.totalorder %s568_s13, %s564_s12  ;;  %s580_s16 = sphi %s613_s16, %s13_s16   ;;  %s576_s15 = sphi %s611_s15, %s684_s15   ;;  %s572_s14 = sphi %s609_s14, %s683_s14   ;;  %s568_s13 = sphi %s607_s13, %s682_s13   ;;  %s564_s12 = sphi %s605_s12, %s681_s12  }
   0x4   : > { %p27_p0 = scmp.ge.s32.totalorder %s25_s17, 2  ;;  %p68_p2 = scmp.eq.s32.totalorder %s580_s16, 0 }
   0x5   : > { %s60_s19 = sadd.s32 1, %s568_s13  ;;  %p464_p5 = scmp.ge.s32.totalorder %s580_s16, 2 }
   0x6   : > { %s686_s17 = smov (%p27_p0, %s25_s17), 0  ;;  %p69_p3 = por %p68_p2, %p67_p1 }
   0x7   : > { %s56_s18 = ssub.s32 %s576_s15, %s686_s17  ;;  %150 = sbr.rel (%p464_p5) target bundleno = 23 (0x17), region = 24 }
   0x8   : > { %p58_p4 = scmp.eq.s32.totalorder %s56_s18, 0 }
   0xa   : > { %s640_s20 = scalar_select %p58_p4, %s568_s13, %s60_s19  }
   0xe   : > { %153 = sbr.rel (!%p69_p3) target bundleno = 23 (0x17), region = 28  ;;  %s155_s21 = sand.u32 (%p69_p3), 1, %s568_s13  }
   0xf   : > { %s466_s22 = sshll.u32 (%p69_p3), %s576_s15, 2  ;;  %s465_s23 = sshll.u32 (%p69_p3), %s155_s21, 5 }
  0x10   : > { %s162_s26 = scalar_lea.vmem (%p69_p3), %s678_s1, %s466_s22  ;;  %s157_s27 = scalar_lea.vmem (%p69_p3), [#allocation3], %s465_s23 }
  0x11   : > { %v178_v0 = vld [vmem:[%s162_s26] sm:$0xf] (%p69_p3)  ;;  %v180_v1 = vld [vmem:[%s162_s26 + $0x8] sm:$0xf] (%p69_p3)  ;;  %v182_v2 = vld [vmem:[%s162_s26 + $0x10] sm:$0xf] (%p69_p3) }
  0x12   : > { %179 = vst [vmem:[%s157_s27] sm:$0xf] (%p69_p3), %v178_v0  ;;  %181 = vst [vmem:[%s157_s27 + $0x4] sm:$0xf] (%p69_p3), %v180_v1  ;;  %v184_v3 = vld [vmem:[%s162_s26 + $0x18] sm:$0xf] (%p69_p3) }
  0x13   : > { %v186_v4 = vld [vmem:[%s162_s26 + $0x20] sm:$0xf] (%p69_p3)  ;;  %183 = vst [vmem:[%s157_s27 + $0x8] sm:$0xf] (%p69_p3), %v182_v2  ;;  %185 = vst [vmem:[%s157_s27 + $0xc] sm:$0xf] (%p69_p3), %v184_v3 }
  0x14   : > { %187 = vst [vmem:[%s157_s27 + $0x10] sm:$0xf] (%p69_p3), %v186_v4  ;;  %v188_v5 = vld [vmem:[%s162_s26 + $0x28] sm:$0xf] (%p69_p3)  ;;  %v190_v6 = vld [vmem:[%s162_s26 + $0x30] sm:$0xf] (%p69_p3) }
  0x15   : > { %v192_v7 = vld [vmem:[%s162_s26 + $0x38] sm:$0xf]  ;;  %189 = vst [vmem:[%s157_s27 + $0x14] sm:$0xf] %v188_v5  ;;  %191 = vst [vmem:[%s157_s27 + $0x18] sm:$0xf] %v190_v6 }
  0x16   : > { %193 = vst [vmem:[%s157_s27 + $0x1c] sm:$0xf] %v192_v7 }
  0x17 PF: > { %p467_p6 = scmp.ge.s32.totalorder %s580_s16, 1  ;;  %p231_p7 = scmp.lt.s32.totalorder %s580_s16, 3 }
  0x19   : > { %p232_p8 = pnand %p467_p6, %p231_p7 }
  0x1a   : > { %s238_s28 = sand.u32 (!%p232_p8), 1, %s564_s12   ;;  %v582_v8 = vmov (!%p232_p8), 0.0   ;;  %vm583_vm0 = vmmov (!%p232_p8), 0   ;;  %v363_v9 = vld [vmem:[%s679_s2] sm:$0xff] (!%p232_p8)  ;;  %v584_v10 = vmov (!%p232_p8), 0   ;;  %vm313_vm1 = vcmask (!%p232_p8), 523264  }
  0x1b   : > { %235 = sbr.rel (%p232_p8) target bundleno = 265 (0x109), region = 69  ;;  %482 = vmatprep.subr.bf16.mxu0 (!%p232_p8), %v582_v8  ;;  %s468_s29 = sshll.u32 (!%p232_p8), %s238_s28, 5  ;;  %490 = vmatprep.mubr.msk.bf16.mxu0 (!%p232_p8), %vm583_vm0, %v582_v8  ;;  %v280_v15 = vld [vmem:[%s677_s0] sm:$0xf] (!%p232_p8) }
  0x1c   : > { %537 = vset.pattern.permute.xlu0 (!%p232_p8), %v584_v10  ;;  %s240_s5 = scalar_lea.vmem (!%p232_p8), [#allocation3], %s468_s29  ;;  %p269_p9 = scmp.lt.s32.totalorder (!%p232_p8), %s572_s14, 1 }
  0x1d   : > { %v538_v11 = vld [vmem:[%s240_s5] sm:$0xff] (!%p232_p8)   ;;  %366 = vperm.xlu0 (!%p232_p8), %537, %v363_v9   ;;  %v539_v12 = vld [vmem:[%s240_s5 + $0x8] sm:$0xff] (!%p232_p8)   ;;  %v540_v13 = vld [vmem:[%s240_s5 + $0x10] sm:$0xff] (!%p232_p8)  }
  0x1e   : > { %483 = vmatpush3.bf16.msra.mxu0 (!%p232_p8), %v538_v11  ;;  %v541_v14 = vld [vmem:[%s240_s5 + $0x18] sm:$0xff] (!%p232_p8)  }
  0x1f   : > { %484 = vmatprep.subr.bf16.mxu0 (!%p232_p8), %v582_v8 }
  0x22   : > { %485 = vmatpush3.bf16.msra.mxu0 %v539_v12  ;;  %s688_s14 = smov (!%p269_p9, %s572_s14), 1 }
  0x23   : > { %486 = vmatprep.subr.bf16.mxu0 %v582_v8  ;;  %s469_s8 = sshll.u32 %s688_s14, 2 }
  0x24   : > { %s272_s11 = scalar_lea.vmem %s680_s3, %s469_s8 }
  0x26   : > { %487 = vmatpush3.bf16.msra.mxu0 %v540_v13 }
  0x27   : > { %488 = vmatprep.subr.bf16.mxu0 %v582_v8 }
  0x2a   : > { %489 = vmatpush3.bf16.msra.mxu0 %v541_v14 }
  0x2d   : > { %491 = vmatmul.mubr.msk.bf16.vlgmr.msra.gmra.mrb[0].mxu0 %vm313_vm1, %v280_v15 }
  0x9c   : > { %v367_v16 = vpop.permute.xlu0 %366 }
 0x100   : > { %v351_v17 = vpop.f32.mrb[0].mxu0 }
 0x101   : > { %v369_v18 = vadd.f32 %v367_v16, %v351_v17  ;;  %v492_v19 = vpop.f32.mrb[1].mxu0 }
 0x102   : > { %v354_v20 = vpop.f32.mrb[2].mxu0 }
 0x103   : > { %vm370_vm2 = vcmp.gt.f32.partialorder %v369_v18, 0.0  ;;  %v371_v21 = vmul.f32 0.2, %v369_v18  ;;  %v493_v22 = vpop.f32.mrb[3].mxu0 }
 0x105   : > { %v372_v23 = vsel %vm370_vm2, %v369_v18, %v371_v21 }
 0x106   : > { %v373_v24 = vpack.c.bf16 %v372_v23, %v372_v23 }
 0x108   : > { %374 = vst [vmem:[%s272_s11] sm:$0xf] %v373_v24 }
 0x109 PF: > { %s13_s16 = sadd.s32 1, %s580_s16   ;;  %s681_s12 = smov %s568_s13 }
 0x10a   : > { %p10_p10 = scmp.ge.s32.totalorder %s13_s16, 4   ;;  %s682_s13 = smov %s640_s20 }
 0x10b   : > { %s683_s14 = smov %s576_s15  ;;  %s684_s15 = smov %s686_s17 }
 0x10c   :  { %12 = sbr.rel (!%p10_p10) target bundleno = 3 (0x3), region = 119 }

// kernel: _forward_impl.15
= control target key start
LH: loop header
LB: loop body
LE: loop exit
PB: predicated region body
PF: predicated region fallthrough
CT: control target
= control target key end

     0   :  { %s773_s12 = smov 0   ;;  %s775_s13 = smov 0   ;;  %s876_s0 = inlined_call_operand.vmem [shape: bf16[16,128], index: 0, kind: input, shape index: {}]   ;;  %s877_s1 = inlined_call_operand.vmem [shape: bf16[128,256], index: 1, kind: input, shape index: {}]   ;;  %s878_s2 = inlined_call_operand.vmem [shape: f32[16,1], index: 2, kind: input, shape index: {}]   ;;  %s879_s3 = inlined_call_operand.vmem [shape: bf16[16,256], index: 3, kind: output, shape index: {}]  }
   0x1   :  { %s777_s14 = smov 0   ;;  %s779_s15 = smov 0  }
   0x2   :  { %s781_s16 = smov 0  }
   0x3 LB: > { %s25_s17 = sadd.s32 1, %s744_s15  ;;  %s596_s18 = sadd.s32 4294967295, %s748_s16   ;;  %s748_s16 = sphi %s781_s16, %s13_s16   ;;  %s744_s15 = sphi %s779_s15, %s884_s15   ;;  %s740_s14 = sphi %s777_s14, %s883_s14   ;;  %s736_s13 = sphi %s775_s13, %s882_s13   ;;  %s732_s12 = sphi %s773_s12, %s881_s12  }
   0x4   : > { %p27_p0 = scmp.ge.s32.totalorder %s25_s17, 2  ;;  %p67_p1 = scmp.ne.s32.totalorder %s736_s13, %s732_s12 }
   0x5   : > { %p68_p2 = scmp.eq.s32.totalorder %s748_s16, 0  ;;  %p118_p4 = scmp.eq.s32.totalorder %s596_s18, 1 }
   0x6   : > { %s886_s17 = smov (%p27_p0, %s25_s17), 0  ;;  %s60_s20 = sadd.s32 1, %s736_s13 }
   0x7   : > { %p69_p3 = por %p68_p2, %p67_p1  ;;  %s56_s19 = ssub.s32 %s744_s15, %s886_s17 }
   0x8   : > { %p58_p5 = scmp.eq.s32.totalorder %s56_s19, 0  ;;  %p808_p6 = por %p118_p4, %p67_p1 }
   0x9   : > { %p600_p7 = scmp.ge.s32.totalorder %s748_s16, 2 }
   0xa   : > { %s813_s22 = scalar_select %p58_p5, %s736_s13, %s60_s20  }
   0xb   : > { %150 = sbr.rel (%p600_p7) target bundleno = 32 (0x20), region = 24 }
  0x12   : > { %153 = sbr.rel (!%p69_p3) target bundleno = 32 (0x20), region = 28  ;;  %s155_s23 = sand.u32 (%p69_p3), 1, %s736_s13  }
  0x13   : > { %s602_s24 = sshll.u32 (%p69_p3), %s744_s15, 2  ;;  %s601_s25 = sshll.u32 (%p69_p3), %s155_s23, 6 }
  0x14   : > { %s821_s28 = scalar_lea.vmem (%p69_p3), %s877_s1, %s602_s24  ;;  %s157_s29 = scalar_lea.vmem (%p69_p3), [#allocation3], %s601_s25 }
  0x15   : > { %v178_v0 = vld [vmem:[%s821_s28] sm:$0xf] (%p69_p3)  ;;  %v180_v1 = vld [vmem:[%s821_s28 + $0x8] sm:$0xf] (%p69_p3)  ;;  %v182_v2 = vld [vmem:[%s821_s28 + $0x10] sm:$0xf] (%p69_p3) }
  0x16   : > { %179 = vst [vmem:[%s157_s29] sm:$0xf] (%p69_p3), %v178_v0  ;;  %181 = vst [vmem:[%s157_s29 + $0x4] sm:$0xf] (%p69_p3), %v180_v1  ;;  %v184_v3 = vld [vmem:[%s821_s28 + $0x18] sm:$0xf] (%p69_p3) }
  0x17   : > { %v186_v4 = vld [vmem:[%s821_s28 + $0x20] sm:$0xf] (%p69_p3)  ;;  %183 = vst [vmem:[%s157_s29 + $0x8] sm:$0xf] (%p69_p3), %v182_v2  ;;  %185 = vst [vmem:[%s157_s29 + $0xc] sm:$0xf] (%p69_p3), %v184_v3 }
  0x18   : > { %187 = vst [vmem:[%s157_s29 + $0x10] sm:$0xf] (%p69_p3), %v186_v4  ;;  %v188_v5 = vld [vmem:[%s821_s28 + $0x28] sm:$0xf] (%p69_p3)  ;;  %v190_v6 = vld [vmem:[%s821_s28 + $0x30] sm:$0xf] (%p69_p3) }
  0x19   : > { %v192_v7 = vld [vmem:[%s821_s28 + $0x38] sm:$0xf]  ;;  %189 = vst [vmem:[%s157_s29 + $0x14] sm:$0xf] %v188_v5  ;;  %191 = vst [vmem:[%s157_s29 + $0x18] sm:$0xf] %v190_v6 }
  0x1a   : > { %193 = vst [vmem:[%s157_s29 + $0x1c] sm:$0xf] %v192_v7  ;;  %v194_v8 = vld [vmem:[%s821_s28 + $0x40] sm:$0xf]  ;;  %v196_v9 = vld [vmem:[%s821_s28 + $0x48] sm:$0xf] }
  0x1b   : > { %v198_v10 = vld [vmem:[%s821_s28 + $0x50] sm:$0xf]  ;;  %195 = vst [vmem:[%s157_s29 + $0x20] sm:$0xf] %v194_v8  ;;  %197 = vst [vmem:[%s157_s29 + $0x24] sm:$0xf] %v196_v9 }
  0x1c   : > { %199 = vst [vmem:[%s157_s29 + $0x28] sm:$0xf] %v198_v10  ;;  %v200_v11 = vld [vmem:[%s821_s28 + $0x58] sm:$0xf]  ;;  %v202_v12 = vld [vmem:[%s821_s28 + $0x60] sm:$0xf] }
  0x1d   : > { %v204_v13 = vld [vmem:[%s821_s28 + $0x68] sm:$0xf]  ;;  %201 = vst [vmem:[%s157_s29 + $0x2c] sm:$0xf] %v200_v11  ;;  %203 = vst [vmem:[%s157_s29 + $0x30] sm:$0xf] %v202_v12 }
  0x1e   : > { %205 = vst [vmem:[%s157_s29 + $0x34] sm:$0xf] %v204_v13  ;;  %v206_v14 = vld [vmem:[%s821_s28 + $0x70] sm:$0xf]  ;;  %v208_v15 = vld [vmem:[%s821_s28 + $0x78] sm:$0xf] }
  0x1f   : > { %207 = vst [vmem:[%s157_s29 + $0x38] sm:$0xf] %v206_v14  ;;  %209 = vst [vmem:[%s157_s29 + $0x3c] sm:$0xf] %v208_v15 }
  0x20 PF: > { %p603_p8 = scmp.ge.s32.totalorder %s748_s16, 1  ;;  %p263_p9 = scmp.lt.s32.totalorder %s748_s16, 3 }
  0x22   : > { %p264_p10 = pnand %p603_p8, %p263_p9 }
  0x23   : > { %s270_s30 = sand.u32 (!%p264_p10), 1, %s732_s12   ;;  %v750_v16 = vmov (!%p264_p10), 0.0   ;;  %vm751_vm0 = vmmov (!%p264_p10), 0   ;;  %v432_v17 = vld [vmem:[%s878_s2] sm:$0xff] (!%p264_p10)  ;;  %v752_v18 = vmov (!%p264_p10), 0   ;;  %v433_v20 = vld [vmem:[%s878_s2 + $0x8] sm:$0xff] (!%p264_p10) }
  0x24   : > { %267 = sbr.rel (%p264_p10) target bundleno = 300 (0x12c), region = 69  ;;  %637 = vmatprep.subr.bf16.mxu0 (!%p264_p10), %v750_v16  ;;  %s604_s4 = sshll.u32 (!%p264_p10), %s270_s30, 6  ;;  %653 = vmatprep.mubr.msk.bf16.mxu0 (!%p264_p10), %vm751_vm0, %v750_v16  ;;  %v709_v28 = vld [vmem:[%s876_s0] sm:$0xff] (!%p264_p10)  }
  0x25   : > { %700 = vset.pattern.permute.xlu0 (!%p264_p10), %v752_v18  ;;  %s272_s7 = scalar_lea.vmem (!%p264_p10), [#allocation3], %s604_s4  ;;  %s605_s18 = sshll.u32 (!%p264_p10), %s270_s30, 3 }
  0x26   : > { %v701_v19 = vld [vmem:[%s272_s7] sm:$0xff] (!%p264_p10)   ;;  %436 = vperm.xlu0 (!%p264_p10), %700, %v432_v17   ;;  %v702_v21 = vld [vmem:[%s272_s7 + $0x8] sm:$0xff] (!%p264_p10)   ;;  %v703_v22 = vld [vmem:[%s272_s7 + $0x10] sm:$0xff] (!%p264_p10)   ;;  %s295_s19 = scalar_lea.vmem (!%p264_p10), [#allocation4], %s605_s18 }
  0x27   : > { %638 = vmatpush3.bf16.msra.mxu0 (!%p264_p10), %v701_v19  ;;  %v704_v23 = vld [vmem:[%s272_s7 + $0x18] sm:$0xff] (!%p264_p10)   ;;  %v705_v24 = vld [vmem:[%s272_s7 + $0x20] sm:$0xff] (!%p264_p10)   ;;  %v706_v25 = vld [vmem:[%s272_s7 + $0x28] sm:$0xff] (!%p264_p10)  }
  0x28   : > { %639 = vmatprep.subr.bf16.mxu0 (!%p264_p10), %v750_v16  ;;  %v707_v26 = vld [vmem:[%s272_s7 + $0x30] sm:$0xff] (!%p264_p10)   ;;  %v708_v27 = vld [vmem:[%s272_s7 + $0x38] sm:$0xff] (!%p264_p10)  }
  0x2a   : > { %441 = vperm.xlu0 (!%p264_p10), %700, %v433_v20  }
  0x2b   : > { %640 = vmatpush3.bf16.msra.mxu0 %v702_v21  ;;  %s618_s20 = sshll.u32 (%p808_p6), %s740_s14, 2 }
  0x2c   : > { %641 = vmatprep.subr.bf16.mxu0 %v750_v16  ;;  %s470_s25 = scalar_lea.vmem (%p808_p6), %s879_s3, %s618_s20 }
  0x2f   : > { %642 = vmatpush3.bf16.msra.mxu0 %v703_v22 }
  0x30   : > { %643 = vmatprep.subr.bf16.mxu0 %v750_v16 }
  0x33   : > { %644 = vmatpush3.bf16.msra.mxu0 %v704_v23 }
  0x34   : > { %645 = vmatprep.subr.bf16.mxu0 %v750_v16 }
  0x37   : > { %646 = vmatpush3.bf16.msra.mxu0 %v705_v24 }
  0x38   : > { %647 = vmatprep.subr.bf16.mxu0 %v750_v16 }
  0x3b   : > { %648 = vmatpush3.bf16.msra.mxu0 %v706_v25 }
  0x3c   : > { %649 = vmatprep.subr.bf16.mxu0 %v750_v16 }
  0x3f   : > { %650 = vmatpush3.bf16.msra.mxu0 %v707_v26 }
  0x40   : > { %651 = vmatprep.subr.bf16.mxu0 %v750_v16 }
  0x43   : > { %652 = vmatpush3.bf16.msra.mxu0 %v708_v27 }
  0x46   : > { %654 = vmatmul.mubr.bf16.vlgmr.msra.gmra.mrb[0].mxu0 %v709_v28 }
  0xa5   : > { %v437_v29 = vpop.permute.xlu0 %436 }
  0xa9   : > { %v442_v33 = vpop.permute.xlu0 %441 }
 0x119   : > { %v416_v30 = vpop.f32.mrb[0].mxu0 }
 0x11a   : > { %v444_v31 = vadd.f32 %v437_v29, %v416_v30  ;;  %v655_v32 = vpop.f32.mrb[1].mxu0 }
 0x11b   : > { %v419_v34 = vpop.f32.mrb[2].mxu0 }
 0x11c   : > { %v448_v35 = vmul.f32 0.2, %v444_v31  ;;  %v445_v36 = vadd.f32 %v442_v33, %v419_v34  ;;  %v656_v37 = vpop.f32.mrb[3].mxu0  ;;  %vm446_vm1 = vcmp.gt.f32.partialorder %v444_v31, 0.0 }
 0x11d   : > { %468 = sbr.rel (!%p808_p6) target bundleno = 300 (0x12c), region = 85 }
 0x11e   : > { %vm447_vm2 = vcmp.gt.f32.partialorder %v445_v36, 0.0  ;;  %v449_v38 = vmul.f32 0.2, %v445_v36  ;;  %v450_v39 = vsel %vm446_vm1, %v444_v31, %v448_v35 }
 0x120   : > { %v451_v40 = vsel %vm447_vm2, %v445_v36, %v449_v38 }
 0x121   : > { %v626_v41 = vpack.c.bf16 %v451_v40, %v450_v39 }
 0x123   : > { %627 = vst [vmem:[%s295_s19] sm:$0xff] %v626_v41  }
 0x12a   : > { %v486_v42 = vld [vmem:[%s295_s19] sm:$0xf]  ;;  %v488_v43 = vld [vmem:[%s295_s19 + $0x4] sm:$0xf] }
 0x12b   : > { %487 = vst [vmem:[%s470_s25] sm:$0xf] %v486_v42  ;;  %489 = vst [vmem:[%s470_s25 + $0x8] sm:$0xf] %v488_v43 }
 0x12c PF: > { %s13_s16 = sadd.s32 1, %s748_s16   ;;  %s881_s12 = smov %s736_s13 }
 0x12d   : > { %p10_p11 = scmp.ge.s32.totalorder %s13_s16, 4   ;;  %s882_s13 = smov %s813_s22 }
 0x12e   : > { %s883_s14 = smov %s744_s15  ;;  %s884_s15 = smov %s886_s17 }
 0x12f   :  { %12 = sbr.rel (!%p10_p11) target bundleno = 3 (0x3), region = 160 }

// kernel: _forward_impl.16
= control target key start
LH: loop header
LB: loop body
LE: loop exit
PB: predicated region body
PF: predicated region fallthrough
CT: control target
= control target key end

     0   :  { %s1024_s12 = smov 0   ;;  %s1026_s13 = smov 0   ;;  %s1210_s0 = inlined_call_operand.vmem [shape: bf16[32,256], index: 0, kind: input, shape index: {}]   ;;  %s1211_s1 = inlined_call_operand.vmem [shape: bf16[256,256], index: 1, kind: input, shape index: {}]   ;;  %s1212_s2 = inlined_call_operand.vmem [shape: f32[32,1], index: 2, kind: input, shape index: {}]   ;;  %s1213_s3 = inlined_call_operand.vmem [shape: bf16[32,256], index: 3, kind: output, shape index: {}]  }
   0x1   :  { %s1028_s14 = smov 0   ;;  %s1030_s15 = smov 0  }
   0x2   :  { %s1032_s16 = smov 0  }
   0x3 LB: > { %s25_s17 = sadd.s32 1, %s997_s15  ;;  %s801_s18 = sadd.s32 4294967295, %s1001_s16   ;;  %s1001_s16 = sphi %s1032_s16, %s13_s16   ;;  %s997_s15 = sphi %s1030_s15, %s1218_s15   ;;  %s993_s14 = sphi %s1028_s14, %s1217_s14   ;;  %s989_s13 = sphi %s1026_s13, %s1216_s13   ;;  %s985_s12 = sphi %s1024_s12, %s1215_s12  }
   0x4   : > { %p27_p0 = scmp.ge.s32.totalorder %s25_s17, 2  ;;  %p67_p1 = scmp.ne.s32.totalorder %s989_s13, %s985_s12 }
   0x5   : > { %p68_p2 = scmp.eq.s32.totalorder %s1001_s16, 0  ;;  %p118_p4 = scmp.eq.s32.totalorder %s801_s18, 1 }
   0x6   : > { %s1220_s17 = smov (%p27_p0, %s25_s17), 0  ;;  %s60_s20 = sadd.s32 1, %s989_s13 }
   0x7   : > { %p69_p3 = por %p68_p2, %p67_p1  ;;  %s56_s19 = ssub.s32 %s997_s15, %s1220_s17 }
   0x8   : > { %p58_p5 = scmp.eq.s32.totalorder %s56_s19, 0  ;;  %p1059_p6 = por %p118_p4, %p67_p1 }
   0x9   : > { %p805_p7 = scmp.ge.s32.totalorder %s1001_s16, 2 }
   0xa   : > { %s1064_s22 = scalar_select %p58_p5, %s989_s13, %s60_s20  }
   0xb   : > { %152 = sbr.rel (%p805_p7) target bundleno = 43 (0x2b), region = 24 }
  0x12   : > { %155 = sbr.rel (!%p69_p3) target bundleno = 43 (0x2b), region = 28  ;;  %s157_s23 = sand.u32 (%p69_p3), 1, %s989_s13  }
  0x13   : > { %s807_s24 = sshll.u32 (%p69_p3), %s997_s15, 2  ;;  %s806_s25 = sshll.u32 (%p69_p3), %s157_s23, 7 }
  0x14   : > { %s1072_s28 = scalar_lea.vmem (%p69_p3), %s1211_s1, %s807_s24  ;;  %s1076_s29 = scalar_lea.vmem (%p69_p3), [#allocation3], %s806_s25 }
  0x15   : > { %v180_v0 = vld [vmem:[%s1072_s28] sm:$0xf] (%p69_p3)  ;;  %v182_v1 = vld [vmem:[%s1072_s28 + $0x8] sm:$0xf] (%p69_p3)  ;;  %v184_v2 = vld [vmem:[%s1072_s28 + $0x10] sm:$0xf] (%p69_p3) }
  0x16   : > { %181 = vst [vmem:[%s1076_s29] sm:$0xf] (%p69_p3), %v180_v0  ;;  %183 = vst [vmem:[%s1076_s29 + $0x4] sm:$0xf] (%p69_p3), %v182_v1  ;;  %v186_v3 = vld [vmem:[%s1072_s28 + $0x18] sm:$0xf] (%p69_p3) }
  0x17   : > { %v188_v4 = vld [vmem:[%s1072_s28 + $0x20] sm:$0xf] (%p69_p3)  ;;  %185 = vst [vmem:[%s1076_s29 + $0x8] sm:$0xf] (%p69_p3), %v184_v2  ;;  %187 = vst [vmem:[%s1076_s29 + $0xc] sm:$0xf] (%p69_p3), %v186_v3 }
  0x18   : > { %189 = vst [vmem:[%s1076_s29 + $0x10] sm:$0xf] (%p69_p3), %v188_v4  ;;  %v190_v5 = vld [vmem:[%s1072_s28 + $0x28] sm:$0xf] (%p69_p3)  ;;  %v192_v6 = vld [vmem:[%s1072_s28 + $0x30] sm:$0xf] (%p69_p3) }
  0x19   : > { %v194_v7 = vld [vmem:[%s1072_s28 + $0x38] sm:$0xf]  ;;  %191 = vst [vmem:[%s1076_s29 + $0x14] sm:$0xf] %v190_v5  ;;  %193 = vst [vmem:[%s1076_s29 + $0x18] sm:$0xf] %v192_v6 }
  0x1a   : > { %195 = vst [vmem:[%s1076_s29 + $0x1c] sm:$0xf] %v194_v7  ;;  %v196_v8 = vld [vmem:[%s1072_s28 + $0x40] sm:$0xf]  ;;  %v198_v9 = vld [vmem:[%s1072_s28 + $0x48] sm:$0xf] }
  0x1b   : > { %v200_v10 = vld [vmem:[%s1072_s28 + $0x50] sm:$0xf]  ;;  %197 = vst [vmem:[%s1076_s29 + $0x20] sm:$0xf] %v196_v8  ;;  %199 = vst [vmem:[%s1076_s29 + $0x24] sm:$0xf] %v198_v9 }
  0x1c   : > { %201 = vst [vmem:[%s1076_s29 + $0x28] sm:$0xf] %v200_v10  ;;  %v202_v11 = vld [vmem:[%s1072_s28 + $0x58] sm:$0xf]  ;;  %v204_v12 = vld [vmem:[%s1072_s28 + $0x60] sm:$0xf] }
  0x1d   : > { %v206_v13 = vld [vmem:[%s1072_s28 + $0x68] sm:$0xf]  ;;  %203 = vst [vmem:[%s1076_s29 + $0x2c] sm:$0xf] %v202_v11  ;;  %205 = vst [vmem:[%s1076_s29 + $0x30] sm:$0xf] %v204_v12 }
  0x1e   : > { %207 = vst [vmem:[%s1076_s29 + $0x34] sm:$0xf] %v206_v13  ;;  %v208_v14 = vld [vmem:[%s1072_s28 + $0x70] sm:$0xf]  ;;  %v210_v15 = vld [vmem:[%s1072_s28 + $0x78] sm:$0xf] }
  0x1f   : > { %v212_v16 = vld [vmem:[%s1072_s28 + $0x80] sm:$0xf]  ;;  %209 = vst [vmem:[%s1076_s29 + $0x38] sm:$0xf] %v208_v14  ;;  %211 = vst [vmem:[%s1076_s29 + $0x3c] sm:$0xf] %v210_v15 }
  0x20   : > { %213 = vst [vmem:[%s1076_s29 + $0x40] sm:$0xf] %v212_v16  ;;  %v214_v17 = vld [vmem:[%s1072_s28 + $0x88] sm:$0xf]  ;;  %v216_v18 = vld [vmem:[%s1072_s28 + $0x90] sm:$0xf] }
  0x21   : > { %v218_v19 = vld [vmem:[%s1072_s28 + $0x98] sm:$0xf]  ;;  %215 = vst [vmem:[%s1076_s29 + $0x44] sm:$0xf] %v214_v17  ;;  %217 = vst [vmem:[%s1076_s29 + $0x48] sm:$0xf] %v216_v18 }
  0x22   : > { %219 = vst [vmem:[%s1076_s29 + $0x4c] sm:$0xf] %v218_v19  ;;  %v220_v20 = vld [vmem:[%s1072_s28 + $0xa0] sm:$0xf]  ;;  %v222_v21 = vld [vmem:[%s1072_s28 + $0xa8] sm:$0xf] }
  0x23   : > { %v224_v22 = vld [vmem:[%s1072_s28 + $0xb0] sm:$0xf]  ;;  %221 = vst [vmem:[%s1076_s29 + $0x50] sm:$0xf] %v220_v20  ;;  %223 = vst [vmem:[%s1076_s29 + $0x54] sm:$0xf] %v222_v21 }
  0x24   : > { %225 = vst [vmem:[%s1076_s29 + $0x58] sm:$0xf] %v224_v22  ;;  %v226_v23 = vld [vmem:[%s1072_s28 + $0xb8] sm:$0xf]  ;;  %v228_v24 = vld [vmem:[%s1072_s28 + $0xc0] sm:$0xf] }
  0x25   : > { %v230_v25 = vld [vmem:[%s1072_s28 + $0xc8] sm:$0xf]  ;;  %227 = vst [vmem:[%s1076_s29 + $0x5c] sm:$0xf] %v226_v23  ;;  %229 = vst [vmem:[%s1076_s29 + $0x60] sm:$0xf] %v228_v24 }
  0x26   : > { %231 = vst [vmem:[%s1076_s29 + $0x64] sm:$0xf] %v230_v25  ;;  %v232_v26 = vld [vmem:[%s1072_s28 + $0xd0] sm:$0xf]  ;;  %v234_v27 = vld [vmem:[%s1072_s28 + $0xd8] sm:$0xf] }
  0x27   : > { %v236_v28 = vld [vmem:[%s1072_s28 + $0xe0] sm:$0xf]  ;;  %233 = vst [vmem:[%s1076_s29 + $0x68] sm:$0xf] %v232_v26  ;;  %235 = vst [vmem:[%s1076_s29 + $0x6c] sm:$0xf] %v234_v27 }
  0x28   : > { %237 = vst [vmem:[%s1076_s29 + $0x70] sm:$0xf] %v236_v28  ;;  %v238_v29 = vld [vmem:[%s1072_s28 + $0xe8] sm:$0xf]  ;;  %v240_v30 = vld [vmem:[%s1072_s28 + $0xf0] sm:$0xf] }
  0x29   : > { %v242_v31 = vld [vmem:[%s1072_s28 + $0xf8] sm:$0xf]  ;;  %239 = vst [vmem:[%s1076_s29 + $0x74] sm:$0xf] %v238_v29  ;;  %241 = vst [vmem:[%s1076_s29 + $0x78] sm:$0xf] %v240_v30 }
  0x2a   : > { %243 = vst [vmem:[%s1076_s29 + $0x7c] sm:$0xf] %v242_v31 }
  0x2b PF: > { %p808_p8 = scmp.ge.s32.totalorder %s1001_s16, 1  ;;  %p329_p9 = scmp.lt.s32.totalorder %s1001_s16, 3 }
  0x2d   : > { %p330_p10 = pnand %p808_p8, %p329_p9 }
  0x2e   : > { %s336_s30 = sand.u32 (!%p330_p10), 1, %s985_s12   ;;  %v959_v32 = vld [vmem:[%s1210_s0 + $0x4] ss:$8 sps:$4 sm:$0xff] (!%p330_p10)   ;;  %v1003_v33 = vmov (!%p330_p10), 0   ;;  %v962_v34 = vld [vmem:[%s1210_s0 + $0x14] ss:$8 sps:$4 sm:$0xff] (!%p330_p10)  }
  0x2f   : > { %333 = sbr.rel (%p330_p10) target bundleno = 316 (0x13c), region = 69  ;;  %s809_s4 = sshll.u32 (!%p330_p10), %s336_s30, 7  ;;  %940 = vset.pattern.permute.xlu1 (!%p330_p10), %v1003_v33  ;;  %939 = vset.pattern.permute.xlu0 (!%p330_p10), %v1003_v33  ;;  %v601_v35 = vld [vmem:[%s1212_s2 + $0x10] sm:$0xff] (!%p330_p10)  ;;  %v599_v47 = vld [vmem:[%s1212_s2] sm:$0xff] (!%p330_p10)  ;;  %v602_v48 = vld [vmem:[%s1212_s2 + $0x18] sm:$0xff] (!%p330_p10) }
  0x30   : > { %s1154_s11 = scalar_lea.vmem (!%p330_p10), [#allocation3], %s809_s4  ;;  %567 = vmatprep.mubr.bf16.mxu0 (!%p330_p10), %v959_v32  ;;  %615 = vperm.xlu1 (!%p330_p10), %940, %v601_v35   ;;  %v600_v49 = vld [vmem:[%s1212_s2 + $0x8] sm:$0xff] (!%p330_p10)  ;;  %v960_v56 = vld [vmem:[%s1210_s0 + $0x10] ss:$8 sps:$4 sm:$0xff] (!%p330_p10)   ;;  %s810_s4 = sshll.u32 (!%p330_p10), %s336_s30, 4 }
  0x31   : > { %v941_v36 = vld [vmem:[%s1154_s11 + $0x40] sm:$0xff] (!%p330_p10)   ;;  %575 = vmatprep.mubr.bf16.mxu1 (!%p330_p10), %v962_v34  ;;  %v943_v38 = vld [vmem:[%s1154_s11 + $0x48] sm:$0xff] (!%p330_p10)   ;;  %v945_v40 = vld [vmem:[%s1154_s11 + $0x50] sm:$0xff] (!%p330_p10)   ;;  %605 = vperm.xlu0 (!%p330_p10), %939, %v599_v47   ;;  %s362_s5 = scalar_lea.vmem (!%p330_p10), [#allocation4], %s810_s4 }
  0x32   : > { %v942_v37 = vld [vmem:[%s1154_s11] sm:$0xff] (!%p330_p10)   ;;  %854 = vmatprep.subr.bf16.mxu0 (!%p330_p10), %v941_v36  ;;  %882 = vmatprep.subr.bf16.mxu1 (!%p330_p10), %v941_v36  ;;  %v944_v39 = vld [vmem:[%s1154_s11 + $0x8] sm:$0xff] (!%p330_p10)   ;;  %v946_v41 = vld [vmem:[%s1154_s11 + $0x10] sm:$0xff] (!%p330_p10)  }
  0x33   : > { %855 = vmatpush3.bf16.msra.mxu0 (!%p330_p10), %v942_v37  ;;  %890 = vmatpush3.bf16.msra.mxu1 (!%p330_p10), %v942_v37  ;;  %v947_v42 = vld [vmem:[%s1154_s11 + $0x58] sm:$0xff] (!%p330_p10)   ;;  %v949_v44 = vld [vmem:[%s1154_s11 + $0x60] sm:$0xff] (!%p330_p10)   ;;  %v951_v46 = vld [vmem:[%s1154_s11 + $0x68] sm:$0xff] (!%p330_p10)  }
  0x34   : > { %856 = vmatprep.subr.bf16.mxu0 (!%p330_p10), %v943_v38  ;;  %883 = vmatprep.subr.bf16.mxu1 (!%p330_p10), %v943_v38  ;;  %v948_v43 = vld [vmem:[%s1154_s11 + $0x18] sm:$0xff] (!%p330_p10)   ;;  %v950_v45 = vld [vmem:[%s1154_s11 + $0x20] sm:$0xff] (!%p330_p10)   ;;  %v952_v50 = vld [vmem:[%s1154_s11 + $0x28] sm:$0xff] (!%p330_p10)  }
  0x35   : > { %620 = vperm.xlu1 (!%p330_p10), %940, %v602_v48   ;;  %v953_v51 = vld [vmem:[%s1154_s11 + $0x70] sm:$0xff] (!%p330_p10)   ;;  %610 = vperm.xlu0 (!%p330_p10), %939, %v600_v49   ;;  %v955_v53 = vld [vmem:[%s1154_s11 + $0x78] sm:$0xff] (!%p330_p10)   ;;  %v957_v55 = vld [vmem:[%s1210_s0] ss:$8 sps:$4 sm:$0xff] (!%p330_p10)  }
  0x36   : > { %v954_v52 = vld [vmem:[%s1154_s11 + $0x30] sm:$0xff]   ;;  %v956_v54 = vld [vmem:[%s1154_s11 + $0x38] sm:$0xff]   ;;  %s836_s6 = sshll.u32 (%p1059_p6), %s993_s14, 2 }
  0x37   : > { %857 = vmatpush3.bf16.msra.mxu0 %v944_v39  ;;  %891 = vmatpush3.bf16.msra.mxu1 %v944_v39  ;;  %s667_s7 = scalar_lea.vmem (%p1059_p6), %s1213_s3, %s836_s6 }
  0x38   : > { %858 = vmatprep.subr.bf16.mxu0 %v945_v40  ;;  %884 = vmatprep.subr.bf16.mxu1 %v945_v40 }
  0x3b   : > { %859 = vmatpush3.bf16.msra.mxu0 %v946_v41  ;;  %892 = vmatpush3.bf16.msra.mxu1 %v946_v41 }
  0x3c   : > { %860 = vmatprep.subr.bf16.mxu0 %v947_v42  ;;  %885 = vmatprep.subr.bf16.mxu1 %v947_v42 }
  0x3f   : > { %861 = vmatpush3.bf16.msra.mxu0 %v948_v43  ;;  %893 = vmatpush3.bf16.msra.mxu1 %v948_v43 }
  0x40   : > { %862 = vmatprep.subr.bf16.mxu0 %v949_v44  ;;  %886 = vmatprep.subr.bf16.mxu1 %v949_v44 }
  0x43   : > { %863 = vmatpush3.bf16.msra.mxu0 %v950_v45  ;;  %894 = vmatpush3.bf16.msra.mxu1 %v950_v45 }
  0x44   : > { %864 = vmatprep.subr.bf16.mxu0 %v951_v46  ;;  %887 = vmatprep.subr.bf16.mxu1 %v951_v46 }
  0x47   : > { %865 = vmatpush3.bf16.msra.mxu0 %v952_v50  ;;  %895 = vmatpush3.bf16.msra.mxu1 %v952_v50 }
  0x48   : > { %866 = vmatprep.subr.bf16.mxu0 %v953_v51  ;;  %888 = vmatprep.subr.bf16.mxu1 %v953_v51 }
  0x4b   : > { %867 = vmatpush3.bf16.msra.mxu0 %v954_v52  ;;  %896 = vmatpush3.bf16.msra.mxu1 %v954_v52 }
  0x4c   : > { %868 = vmatprep.subr.bf16.mxu0 %v955_v53  ;;  %889 = vmatprep.subr.bf16.mxu1 %v955_v53 }
  0x4f   : > { %869 = vmatpush3.bf16.msra.mxu0 %v956_v54  ;;  %897 = vmatpush3.bf16.msra.mxu1 %v956_v54 }
  0x52   : > { %568 = vmatmul.mubr.bf16.vlgmr.msra.gmra.mrb[0].mxu0 %v957_v55  ;;  %576 = vmatmul.mubr.bf16.vlgmr.msra.gmra.mrb[0].mxu1 %v960_v56 }
  0xaf   : > { %v616_v57 = vpop.permute.xlu1 %615 }
  0xb0   : > { %v606_v58 = vpop.permute.xlu0 %605 }
  0xb4   : > { %v621_v9 = vpop.permute.xlu1 %620  ;;  %v611_v10 = vpop.permute.xlu0 %610 }
 0x125   : > { %v870_v59 = vpop.f32.mrb[0].mxu0  ;;  %v876_v60 = vpop.f32.mrb[0].mxu1 }
 0x126   : > { %v871_v61 = vpop.f32.mrb[1].mxu0  ;;  %v877_v62 = vpop.f32.mrb[1].mxu1 }
 0x127   : > { %v872_v63 = vadd.f32 %v871_v61, %v870_v59  ;;  %v878_v0 = vadd.f32 %v877_v62, %v876_v60  ;;  %v873_v1 = vpop.f32.mrb[2].mxu0  ;;  %v879_v2 = vpop.f32.mrb[2].mxu1 }
 0x128   : > { %v874_v3 = vpop.f32.mrb[3].mxu0  ;;  %v880_v4 = vpop.f32.mrb[3].mxu1 }
 0x129   : > { %v623_v5 = vadd.f32 %v872_v63, %v606_v58  ;;  %v625_v6 = vadd.f32 %v878_v0, %v616_v57  ;;  %v875_v7 = vadd.f32 %v874_v3, %v873_v1  ;;  %v881_v8 = vadd.f32 %v880_v4, %v879_v2 }
 0x12b   : > { %v631_v11 = vmul.f32 0.2, %v623_v5  ;;  %v633_v12 = vmul.f32 0.2, %v625_v6  ;;  %v624_v13 = vadd.f32 %v875_v7, %v611_v10  ;;  %v626_v14 = vadd.f32 %v881_v8, %v621_v9 }
 0x12c   : > { %vm627_vm0 = vcmp.gt.f32.partialorder %v623_v5, 0.0  ;;  %vm629_vm1 = vcmp.gt.f32.partialorder %v625_v6, 0.0  ;;  %665 = sbr.rel (!%p1059_p6) target bundleno = 316 (0x13c), region = 85 }
 0x12d   : > { %vm628_vm2 = vcmp.gt.f32.partialorder %v624_v13, 0.0  ;;  %v632_v15 = vmul.f32 0.2, %v624_v13  ;;  %vm630_vm3 = vcmp.gt.f32.partialorder %v626_v14, 0.0  ;;  %v634_v16 = vmul.f32 0.2, %v626_v14 }
 0x12e   : > { %v635_v17 = vsel %vm627_vm0, %v623_v5, %v631_v11  ;;  %v637_v18 = vsel %vm629_vm1, %v625_v6, %v633_v12 }
 0x12f   : > { %v636_v19 = vsel %vm628_vm2, %v624_v13, %v632_v15  ;;  %v638_v20 = vsel %vm630_vm3, %v626_v14, %v634_v16 }
 0x130   : > { %v846_v21 = vpack.c.bf16 %v636_v19, %v635_v17  ;;  %v851_v22 = vpack.c.bf16 %v638_v20, %v637_v18 }
 0x132   : > { %847 = vst [vmem:[%s362_s5] sm:$0xff] %v846_v21   ;;  %853 = vst [vmem:[%s362_s5 + $0x8] sm:$0xff] %v851_v22  }
 0x139   : > { %v683_v23 = vld [vmem:[%s362_s5] sm:$0xf]  ;;  %v685_v24 = vld [vmem:[%s362_s5 + $0x4] sm:$0xf]  ;;  %v687_v25 = vld [vmem:[%s362_s5 + $0x8] sm:$0xf] }
 0x13a   : > { %v689_v26 = vld [vmem:[%s362_s5 + $0xc] sm:$0xf]  ;;  %684 = vst [vmem:[%s667_s7] sm:$0xf] %v683_v23  ;;  %686 = vst [vmem:[%s667_s7 + $0x8] sm:$0xf] %v685_v24 }
 0x13b   : > { %688 = vst [vmem:[%s667_s7 + $0x10] sm:$0xf] %v687_v25  ;;  %690 = vst [vmem:[%s667_s7 + $0x18] sm:$0xf] %v689_v26 }
 0x13c PF: > { %s13_s16 = sadd.s32 1, %s1001_s16   ;;  %s1215_s12 = smov %s989_s13 }
 0x13d   : > { %p10_p11 = scmp.ge.s32.totalorder %s13_s16, 4   ;;  %s1216_s13 = smov %s1064_s22 }
 0x13e   : > { %s1217_s14 = smov %s997_s15  ;;  %s1218_s15 = smov %s1220_s17 }
 0x13f   :  { %12 = sbr.rel (!%p10_p11) target bundleno = 3 (0x3), region = 160 }

// kernel: _forward_impl.17
= control target key start
LH: loop header
LB: loop body
LE: loop exit
PB: predicated region body
PF: predicated region fallthrough
CT: control target
= control target key end

     0   :  { %s1203_s12 = smov 0   ;;  %s1205_s13 = smov 0   ;;  %s1456_s0 = inlined_call_operand.vmem [shape: bf16[8,512], index: 0, kind: input, shape index: {}]   ;;  %s1457_s1 = inlined_call_operand.vmem [shape: bf16[512,256], index: 1, kind: input, shape index: {}]   ;;  %s1458_s2 = inlined_call_operand.vmem [shape: f32[8,1], index: 2, kind: input, shape index: {}]   ;;  %s1459_s3 = inlined_call_operand.vmem [shape: bf16[8,256], index: 3, kind: output, shape index: {}]  }
   0x1   :  { %s1207_s14 = smov 0   ;;  %s1209_s15 = smov 0  }
   0x2   :  { %s1211_s16 = smov 0  }
   0x3 LB: > { %s25_s17 = sadd.s32 1, %s1176_s15  ;;  %p67_p1 = scmp.ne.s32.totalorder %s1168_s13, %s1164_s12  ;;  %s1180_s16 = sphi %s1211_s16, %s13_s16   ;;  %s1176_s15 = sphi %s1209_s15, %s1463_s15   ;;  %s1172_s14 = sphi %s1207_s14, %s1462_s14   ;;  %s1168_s13 = sphi %s1205_s13, %s1461_s13   ;;  %s1164_s12 = sphi %s1203_s12, %s1460_s12  }
   0x4   : > { %p27_p0 = scmp.ge.s32.totalorder %s25_s17, 2  ;;  %p68_p2 = scmp.eq.s32.totalorder %s1180_s16, 0 }
   0x5   : > { %s60_s19 = sadd.s32 1, %s1168_s13  ;;  %p971_p5 = scmp.ge.s32.totalorder %s1180_s16, 2 }
   0x6   : > { %s1465_s17 = smov (%p27_p0, %s25_s17), 0  ;;  %p69_p3 = por %p68_p2, %p67_p1 }
   0x7   : > { %s56_s18 = ssub.s32 %s1176_s15, %s1465_s17  ;;  %152 = sbr.rel (%p971_p5) target bundleno = 60 (0x3c), region = 24 }
   0x8   : > { %p58_p4 = scmp.eq.s32.totalorder %s56_s18, 0 }
   0xa   : > { %s1238_s20 = scalar_select %p58_p4, %s1168_s13, %s60_s19  }
   0xe   : > { %155 = sbr.rel (!%p69_p3) target bundleno = 60 (0x3c), region = 28  ;;  %s157_s21 = sand.u32 (%p69_p3), 1, %s1168_s13  }
   0xf   : > { %s973_s22 = sshll.u32 (%p69_p3), %s1176_s15, 2  ;;  %s972_s23 = sshll.u32 (%p69_p3), %s157_s21, 8 }
  0x10   : > { %s1246_s26 = scalar_lea.vmem (%p69_p3), %s1457_s1, %s973_s22  ;;  %s1250_s27 = scalar_lea.vmem (%p69_p3), [#allocation3], %s972_s23 }
  0x11   : > { %v180_v0 = vld [vmem:[%s1246_s26] sm:$0xf] (%p69_p3)  ;;  %v182_v1 = vld [vmem:[%s1246_s26 + $0x8] sm:$0xf] (%p69_p3)  ;;  %v184_v2 = vld [vmem:[%s1246_s26 + $0x10] sm:$0xf] (%p69_p3) }
  0x12   : > { %181 = vst [vmem:[%s1250_s27] sm:$0xf] (%p69_p3), %v180_v0  ;;  %183 = vst [vmem:[%s1250_s27 + $0x4] sm:$0xf] (%p69_p3), %v182_v1  ;;  %v186_v3 = vld [vmem:[%s1246_s26 + $0x18] sm:$0xf] (%p69_p3) }
  0x13   : > { %v188_v4 = vld [vmem:[%s1246_s26 + $0x20] sm:$0xf] (%p69_p3)  ;;  %185 = vst [vmem:[%s1250_s27 + $0x8] sm:$0xf] (%p69_p3), %v184_v2  ;;  %187 = vst [vmem:[%s1250_s27 + $0xc] sm:$0xf] (%p69_p3), %v186_v3 }
  0x14   : > { %189 = vst [vmem:[%s1250_s27 + $0x10] sm:$0xf] (%p69_p3), %v188_v4  ;;  %v190_v5 = vld [vmem:[%s1246_s26 + $0x28] sm:$0xf] (%p69_p3)  ;;  %v192_v6 = vld [vmem:[%s1246_s26 + $0x30] sm:$0xf] (%p69_p3) }
  0x15   : > { %v194_v7 = vld [vmem:[%s1246_s26 + $0x38] sm:$0xf]  ;;  %191 = vst [vmem:[%s1250_s27 + $0x14] sm:$0xf] %v190_v5  ;;  %193 = vst [vmem:[%s1250_s27 + $0x18] sm:$0xf] %v192_v6 }
  0x16   : > { %195 = vst [vmem:[%s1250_s27 + $0x1c] sm:$0xf] %v194_v7  ;;  %v196_v8 = vld [vmem:[%s1246_s26 + $0x40] sm:$0xf]  ;;  %v198_v9 = vld [vmem:[%s1246_s26 + $0x48] sm:$0xf] }
  0x17   : > { %v200_v10 = vld [vmem:[%s1246_s26 + $0x50] sm:$0xf]  ;;  %197 = vst [vmem:[%s1250_s27 + $0x20] sm:$0xf] %v196_v8  ;;  %199 = vst [vmem:[%s1250_s27 + $0x24] sm:$0xf] %v198_v9 }
  0x18   : > { %201 = vst [vmem:[%s1250_s27 + $0x28] sm:$0xf] %v200_v10  ;;  %v202_v11 = vld [vmem:[%s1246_s26 + $0x58] sm:$0xf]  ;;  %v204_v12 = vld [vmem:[%s1246_s26 + $0x60] sm:$0xf] }
  0x19   : > { %v206_v13 = vld [vmem:[%s1246_s26 + $0x68] sm:$0xf]  ;;  %203 = vst [vmem:[%s1250_s27 + $0x2c] sm:$0xf] %v202_v11  ;;  %205 = vst [vmem:[%s1250_s27 + $0x30] sm:$0xf] %v204_v12 }
  0x1a   : > { %207 = vst [vmem:[%s1250_s27 + $0x34] sm:$0xf] %v206_v13  ;;  %v208_v14 = vld [vmem:[%s1246_s26 + $0x70] sm:$0xf]  ;;  %v210_v15 = vld [vmem:[%s1246_s26 + $0x78] sm:$0xf] }
  0x1b   : > { %v212_v16 = vld [vmem:[%s1246_s26 + $0x80] sm:$0xf]  ;;  %209 = vst [vmem:[%s1250_s27 + $0x38] sm:$0xf] %v208_v14  ;;  %211 = vst [vmem:[%s1250_s27 + $0x3c] sm:$0xf] %v210_v15 }
  0x1c   : > { %213 = vst [vmem:[%s1250_s27 + $0x40] sm:$0xf] %v212_v16  ;;  %v214_v17 = vld [vmem:[%s1246_s26 + $0x88] sm:$0xf]  ;;  %v216_v18 = vld [vmem:[%s1246_s26 + $0x90] sm:$0xf] }
  0x1d   : > { %v218_v19 = vld [vmem:[%s1246_s26 + $0x98] sm:$0xf]  ;;  %215 = vst [vmem:[%s1250_s27 + $0x44] sm:$0xf] %v214_v17  ;;  %217 = vst [vmem:[%s1250_s27 + $0x48] sm:$0xf] %v216_v18 }
  0x1e   : > { %219 = vst [vmem:[%s1250_s27 + $0x4c] sm:$0xf] %v218_v19  ;;  %v220_v20 = vld [vmem:[%s1246_s26 + $0xa0] sm:$0xf]  ;;  %v222_v21 = vld [vmem:[%s1246_s26 + $0xa8] sm:$0xf] }
  0x1f   : > { %v224_v22 = vld [vmem:[%s1246_s26 + $0xb0] sm:$0xf]  ;;  %221 = vst [vmem:[%s1250_s27 + $0x50] sm:$0xf] %v220_v20  ;;  %223 = vst [vmem:[%s1250_s27 + $0x54] sm:$0xf] %v222_v21 }
  0x20   : > { %225 = vst [vmem:[%s1250_s27 + $0x58] sm:$0xf] %v224_v22  ;;  %v226_v23 = vld [vmem:[%s1246_s26 + $0xb8] sm:$0xf]  ;;  %v228_v24 = vld [vmem:[%s1246_s26 + $0xc0] sm:$0xf] }
  0x21   : > { %v230_v25 = vld [vmem:[%s1246_s26 + $0xc8] sm:$0xf]  ;;  %227 = vst [vmem:[%s1250_s27 + $0x5c] sm:$0xf] %v226_v23  ;;  %229 = vst [vmem:[%s1250_s27 + $0x60] sm:$0xf] %v228_v24 }
  0x22   : > { %231 = vst [vmem:[%s1250_s27 + $0x64] sm:$0xf] %v230_v25  ;;  %v232_v26 = vld [vmem:[%s1246_s26 + $0xd0] sm:$0xf]  ;;  %v234_v27 = vld [vmem:[%s1246_s26 + $0xd8] sm:$0xf] }
  0x23   : > { %v236_v28 = vld [vmem:[%s1246_s26 + $0xe0] sm:$0xf]  ;;  %233 = vst [vmem:[%s1250_s27 + $0x68] sm:$0xf] %v232_v26  ;;  %235 = vst [vmem:[%s1250_s27 + $0x6c] sm:$0xf] %v234_v27 }
  0x24   : > { %237 = vst [vmem:[%s1250_s27 + $0x70] sm:$0xf] %v236_v28  ;;  %v238_v29 = vld [vmem:[%s1246_s26 + $0xe8] sm:$0xf]  ;;  %v240_v30 = vld [vmem:[%s1246_s26 + $0xf0] sm:$0xf] }
  0x25   : > { %v242_v31 = vld [vmem:[%s1246_s26 + $0xf8] sm:$0xf]  ;;  %239 = vst [vmem:[%s1250_s27 + $0x74] sm:$0xf] %v238_v29  ;;  %241 = vst [vmem:[%s1250_s27 + $0x78] sm:$0xf] %v240_v30 }
  0x26   : > { %243 = vst [vmem:[%s1250_s27 + $0x7c] sm:$0xf] %v242_v31  ;;  %v244_v32 = vld [vmem:[%s1246_s26 + $0x100] sm:$0xf]  ;;  %v246_v33 = vld [vmem:[%s1246_s26 + $0x108] sm:$0xf] }
  0x27   : > { %v248_v34 = vld [vmem:[%s1246_s26 + $0x110] sm:$0xf]  ;;  %245 = vst [vmem:[%s1250_s27 + $0x80] sm:$0xf] %v244_v32  ;;  %247 = vst [vmem:[%s1250_s27 + $0x84] sm:$0xf] %v246_v33 }
  0x28   : > { %249 = vst [vmem:[%s1250_s27 + $0x88] sm:$0xf] %v248_v34  ;;  %v250_v35 = vld [vmem:[%s1246_s26 + $0x118] sm:$0xf]  ;;  %v252_v36 = vld [vmem:[%s1246_s26 + $0x120] sm:$0xf] }
  0x29   : > { %v254_v37 = vld [vmem:[%s1246_s26 + $0x128] sm:$0xf]  ;;  %251 = vst [vmem:[%s1250_s27 + $0x8c] sm:$0xf] %v250_v35  ;;  %253 = vst [vmem:[%s1250_s27 + $0x90] sm:$0xf] %v252_v36 }
  0x2a   : > { %255 = vst [vmem:[%s1250_s27 + $0x94] sm:$0xf] %v254_v37  ;;  %v256_v38 = vld [vmem:[%s1246_s26 + $0x130] sm:$0xf]  ;;  %v258_v39 = vld [vmem:[%s1246_s26 + $0x138] sm:$0xf] }
  0x2b   : > { %v260_v40 = vld [vmem:[%s1246_s26 + $0x140] sm:$0xf]  ;;  %257 = vst [vmem:[%s1250_s27 + $0x98] sm:$0xf] %v256_v38  ;;  %259 = vst [vmem:[%s1250_s27 + $0x9c] sm:$0xf] %v258_v39 }
  0x2c   : > { %261 = vst [vmem:[%s1250_s27 + $0xa0] sm:$0xf] %v260_v40  ;;  %v262_v41 = vld [vmem:[%s1246_s26 + $0x148] sm:$0xf]  ;;  %v264_v42 = vld [vmem:[%s1246_s26 + $0x150] sm:$0xf] }
  0x2d   : > { %v266_v43 = vld [vmem:[%s1246_s26 + $0x158] sm:$0xf]  ;;  %263 = vst [vmem:[%s1250_s27 + $0xa4] sm:$0xf] %v262_v41  ;;  %265 = vst [vmem:[%s1250_s27 + $0xa8] sm:$0xf] %v264_v42 }
  0x2e   : > { %267 = vst [vmem:[%s1250_s27 + $0xac] sm:$0xf] %v266_v43  ;;  %v268_v44 = vld [vmem:[%s1246_s26 + $0x160] sm:$0xf]  ;;  %v270_v45 = vld [vmem:[%s1246_s26 + $0x168] sm:$0xf] }
  0x2f   : > { %v272_v46 = vld [vmem:[%s1246_s26 + $0x170] sm:$0xf]  ;;  %269 = vst [vmem:[%s1250_s27 + $0xb0] sm:$0xf] %v268_v44  ;;  %271 = vst [vmem:[%s1250_s27 + $0xb4] sm:$0xf] %v270_v45 }
  0x30   : > { %273 = vst [vmem:[%s1250_s27 + $0xb8] sm:$0xf] %v272_v46  ;;  %v274_v47 = vld [vmem:[%s1246_s26 + $0x178] sm:$0xf]  ;;  %v276_v48 = vld [vmem:[%s1246_s26 + $0x180] sm:$0xf] }
  0x31   : > { %v278_v49 = vld [vmem:[%s1246_s26 + $0x188] sm:$0xf]  ;;  %275 = vst [vmem:[%s1250_s27 + $0xbc] sm:$0xf] %v274_v47  ;;  %277 = vst [vmem:[%s1250_s27 + $0xc0] sm:$0xf] %v276_v48 }
  0x32   : > { %279 = vst [vmem:[%s1250_s27 + $0xc4] sm:$0xf] %v278_v49  ;;  %v280_v50 = vld [vmem:[%s1246_s26 + $0x190] sm:$0xf]  ;;  %v282_v51 = vld [vmem:[%s1246_s26 + $0x198] sm:$0xf] }
  0x33   : > { %v284_v52 = vld [vmem:[%s1246_s26 + $0x1a0] sm:$0xf]  ;;  %281 = vst [vmem:[%s1250_s27 + $0xc8] sm:$0xf] %v280_v50  ;;  %283 = vst [vmem:[%s1250_s27 + $0xcc] sm:$0xf] %v282_v51 }
  0x34   : > { %285 = vst [vmem:[%s1250_s27 + $0xd0] sm:$0xf] %v284_v52  ;;  %v286_v53 = vld [vmem:[%s1246_s26 + $0x1a8] sm:$0xf]  ;;  %v288_v54 = vld [vmem:[%s1246_s26 + $0x1b0] sm:$0xf] }
  0x35   : > { %v290_v55 = vld [vmem:[%s1246_s26 + $0x1b8] sm:$0xf]  ;;  %287 = vst [vmem:[%s1250_s27 + $0xd4] sm:$0xf] %v286_v53  ;;  %289 = vst [vmem:[%s1250_s27 + $0xd8] sm:$0xf] %v288_v54 }
  0x36   : > { %291 = vst [vmem:[%s1250_s27 + $0xdc] sm:$0xf] %v290_v55  ;;  %v292_v56 = vld [vmem:[%s1246_s26 + $0x1c0] sm:$0xf]  ;;  %v294_v57 = vld [vmem:[%s1246_s26 + $0x1c8] sm:$0xf] }
  0x37   : > { %v296_v58 = vld [vmem:[%s1246_s26 + $0x1d0] sm:$0xf]  ;;  %293 = vst [vmem:[%s1250_s27 + $0xe0] sm:$0xf] %v292_v56  ;;  %295 = vst [vmem:[%s1250_s27 + $0xe4] sm:$0xf] %v294_v57 }
  0x38   : > { %297 = vst [vmem:[%s1250_s27 + $0xe8] sm:$0xf] %v296_v58  ;;  %v298_v59 = vld [vmem:[%s1246_s26 + $0x1d8] sm:$0xf]  ;;  %v300_v60 = vld [vmem:[%s1246_s26 + $0x1e0] sm:$0xf] }
  0x39   : > { %v302_v61 = vld [vmem:[%s1246_s26 + $0x1e8] sm:$0xf]  ;;  %299 = vst [vmem:[%s1250_s27 + $0xec] sm:$0xf] %v298_v59  ;;  %301 = vst [vmem:[%s1250_s27 + $0xf0] sm:$0xf] %v300_v60 }
  0x3a   : > { %303 = vst [vmem:[%s1250_s27 + $0xf4] sm:$0xf] %v302_v61  ;;  %v304_v62 = vld [vmem:[%s1246_s26 + $0x1f0] sm:$0xf]  ;;  %v306_v63 = vld [vmem:[%s1246_s26 + $0x1f8] sm:$0xf] }
  0x3b   : > { %305 = vst [vmem:[%s1250_s27 + $0xf8] sm:$0xf] %v304_v62  ;;  %307 = vst [vmem:[%s1250_s27 + $0xfc] sm:$0xf] %v306_v63 }
  0x3c PF: > { %p974_p6 = scmp.ge.s32.totalorder %s1180_s16, 1  ;;  %p457_p7 = scmp.lt.s32.totalorder %s1180_s16, 3 }
  0x3e   : > { %p458_p8 = pnand %p974_p6, %p457_p7 }
  0x3f   : > { %s464_s28 = sand.u32 (!%p458_p8), 1, %s1164_s12   ;;  %v1384_v0 = vld [vmem:[%s1456_s0] sm:$0xff] (!%p458_p8)  ;;  %v1389_v1 = vld [vmem:[%s1456_s0 + $0x8] sm:$0xff] (!%p458_p8)  ;;  %v1182_v5 = vmov (!%p458_p8), 0   ;;  %p498_p9 = scmp.lt.s32.totalorder (!%p458_p8), %s1172_s14, 1 }
  0x40   : > { %461 = sbr.rel (%p458_p8) target bundleno = 349 (0x15d), region = 69  ;;  %v867_v2 = vld [vmem:[%s1458_s2] sm:$0xff] (!%p458_p8)  ;;  %s975_s8 = sshll.u32 (!%p458_p8), %s464_s28, 8  ;;  %v978_v3 = vcombine.high (!%p458_p8), %v1384_v0, %v1384_v0  ;;  %v980_v4 = vcombine.high (!%p458_p8), %v1389_v1, %v1389_v1  ;;  %1101 = vset.pattern.permute.xlu0 (!%p458_p8), %v1182_v5  ;;  %v977_v38 = vcombine.low (!%p458_p8), %v1384_v0, %v1384_v0  ;;  %v979_v39 = vcombine.low (!%p458_p8), %v1389_v1, %v1389_v1 }
  0x41   : > { %870 = vperm.xlu0 (!%p458_p8), %1101, %v867_v2   ;;  %s1398_s9 = scalar_lea.vmem (!%p458_p8), [#allocation3], %s975_s8 }
  0x42   : > { %v1102_v6 = vld [vmem:[%s1398_s9 + $0x40] sm:$0xff] (!%p458_p8)   ;;  %813 = vmatprep.mubr.bf16.mxu0 (!%p458_p8), %v978_v3  ;;  %853 = vmatprep.mubr.bf16.mxu1 (!%p458_p8), %v980_v4  ;;  %v1106_v10 = vld [vmem:[%s1398_s9 + $0x48] sm:$0xff] (!%p458_p8)   ;;  %v1110_v14 = vld [vmem:[%s1398_s9 + $0x50] sm:$0xff] (!%p458_p8)  }
  0x43   : > { %v1103_v7 = vld [vmem:[%s1398_s9 + $0xc0] sm:$0xff] (!%p458_p8)   ;;  %1016 = vmatprep.subr.bf16.mxu0 (!%p458_p8), %v1102_v6  ;;  %v1107_v11 = vld [vmem:[%s1398_s9 + $0xc8] sm:$0xff] (!%p458_p8)   ;;  %v1111_v15 = vld [vmem:[%s1398_s9 + $0xd0] sm:$0xff] (!%p458_p8)  }
  0x44   : > { %v1104_v8 = vld [vmem:[%s1398_s9] sm:$0xff] (!%p458_p8)   ;;  %1038 = vmatprep.subr.bf16.mxu1 (!%p458_p8), %v1103_v7  ;;  %v1108_v12 = vld [vmem:[%s1398_s9 + $0x8] sm:$0xff] (!%p458_p8)   ;;  %v1112_v16 = vld [vmem:[%s1398_s9 + $0x10] sm:$0xff] (!%p458_p8)  }
  0x45   : > { %v1105_v9 = vld [vmem:[%s1398_s9 + $0x80] sm:$0xff] (!%p458_p8)   ;;  %1017 = vmatpush3.bf16.msra.mxu0 (!%p458_p8), %v1104_v8  ;;  %v1109_v13 = vld [vmem:[%s1398_s9 + $0x88] sm:$0xff] (!%p458_p8)   ;;  %v1113_v17 = vld [vmem:[%s1398_s9 + $0x90] sm:$0xff] (!%p458_p8)  }
  0x46   : > { %1039 = vmatpush3.bf16.msra.mxu1 (!%p458_p8), %v1105_v9  ;;  %1018 = vmatprep.subr.bf16.mxu0 (!%p458_p8), %v1106_v10  ;;  %v1114_v18 = vld [vmem:[%s1398_s9 + $0x58] sm:$0xff] (!%p458_p8)   ;;  %v1118_v22 = vld [vmem:[%s1398_s9 + $0x60] sm:$0xff] (!%p458_p8)   ;;  %v1122_v26 = vld [vmem:[%s1398_s9 + $0x68] sm:$0xff] (!%p458_p8)  }
  0x47   : > { %1040 = vmatprep.subr.bf16.mxu1 %v1107_v11  ;;  %v1115_v19 = vld [vmem:[%s1398_s9 + $0xd8] sm:$0xff]   ;;  %v1119_v23 = vld [vmem:[%s1398_s9 + $0xe0] sm:$0xff]   ;;  %v1123_v27 = vld [vmem:[%s1398_s9 + $0xe8] sm:$0xff]   ;;  %s1467_s14 = smov (!%p498_p9, %s1172_s14), 1 }
  0x48   : > { %v1116_v20 = vld [vmem:[%s1398_s9 + $0x18] sm:$0xff]   ;;  %v1120_v24 = vld [vmem:[%s1398_s9 + $0x20] sm:$0xff]   ;;  %v1124_v28 = vld [vmem:[%s1398_s9 + $0x28] sm:$0xff]   ;;  %s976_s10 = sshll.u32 %s1467_s14, 2 }
  0x49   : > { %1019 = vmatpush3.bf16.msra.mxu0 %v1108_v12  ;;  %v1117_v21 = vld [vmem:[%s1398_s9 + $0x98] sm:$0xff]   ;;  %v1121_v25 = vld [vmem:[%s1398_s9 + $0xa0] sm:$0xff]   ;;  %v1125_v29 = vld [vmem:[%s1398_s9 + $0xa8] sm:$0xff]   ;;  %s501_s18 = scalar_lea.vmem %s1459_s3, %s976_s10 }
  0x4a   : > { %1041 = vmatpush3.bf16.msra.mxu1 %v1109_v13  ;;  %1020 = vmatprep.subr.bf16.mxu0 %v1110_v14  ;;  %v1126_v30 = vld [vmem:[%s1398_s9 + $0x70] sm:$0xff]   ;;  %v1130_v34 = vld [vmem:[%s1398_s9 + $0x78] sm:$0xff]  }
  0x4b   : > { %1042 = vmatprep.subr.bf16.mxu1 %v1111_v15  ;;  %v1127_v31 = vld [vmem:[%s1398_s9 + $0xf0] sm:$0xff]   ;;  %v1131_v35 = vld [vmem:[%s1398_s9 + $0xf8] sm:$0xff]  }
  0x4c   : > { %v1128_v32 = vld [vmem:[%s1398_s9 + $0x30] sm:$0xff]   ;;  %v1132_v36 = vld [vmem:[%s1398_s9 + $0x38] sm:$0xff]  }
  0x4d   : > { %1021 = vmatpush3.bf16.msra.mxu0 %v1112_v16  ;;  %v1129_v33 = vld [vmem:[%s1398_s9 + $0xb0] sm:$0xff]   ;;  %v1133_v37 = vld [vmem:[%s1398_s9 + $0xb8] sm:$0xff]  }
  0x4e   : > { %1043 = vmatpush3.bf16.msra.mxu1 %v1113_v17  ;;  %1022 = vmatprep.subr.bf16.mxu0 %v1114_v18 }
  0x4f   : > { %1044 = vmatprep.subr.bf16.mxu1 %v1115_v19 }
  0x51   : > { %1023 = vmatpush3.bf16.msra.mxu0 %v1116_v20 }
  0x52   : > { %1045 = vmatpush3.bf16.msra.mxu1 %v1117_v21  ;;  %1024 = vmatprep.subr.bf16.mxu0 %v1118_v22 }
  0x53   : > { %1046 = vmatprep.subr.bf16.mxu1 %v1119_v23 }
  0x55   : > { %1025 = vmatpush3.bf16.msra.mxu0 %v1120_v24 }
  0x56   : > { %1047 = vmatpush3.bf16.msra.mxu1 %v1121_v25  ;;  %1026 = vmatprep.subr.bf16.mxu0 %v1122_v26 }
  0x57   : > { %1048 = vmatprep.subr.bf16.mxu1 %v1123_v27 }
  0x59   : > { %1027 = vmatpush3.bf16.msra.mxu0 %v1124_v28 }
  0x5a   : > { %1049 = vmatpush3.bf16.msra.mxu1 %v1125_v29  ;;  %1028 = vmatprep.subr.bf16.mxu0 %v1126_v30 }
  0x5b   : > { %1050 = vmatprep.subr.bf16.mxu1 %v1127_v31 }
  0x5d   : > { %1029 = vmatpush3.bf16.msra.mxu0 %v1128_v32 }
  0x5e   : > { %1051 = vmatpush3.bf16.msra.mxu1 %v1129_v33  ;;  %1030 = vmatprep.subr.bf16.mxu0 %v1130_v34 }
  0x5f   : > { %1052 = vmatprep.subr.bf16.mxu1 %v1131_v35 }
  0x61   : > { %1031 = vmatpush3.bf16.msra.mxu0 %v1132_v36 }
  0x62   : > { %1053 = vmatpush3.bf16.msra.mxu1 %v1133_v37 }
  0x64   : > { %814 = vmatmul.mubr.bf16.vlgmr.msra.gmra.mrb[0].mxu0 %v977_v38 }
  0x65   : > { %854 = vmatmul.mubr.bf16.vlgmr.msra.gmra.mrb[0].mxu1 %v979_v39 }
  0xc0   : > { %v871_v50 = vpop.permute.xlu0 %870 }
 0x137   : > { %v1032_v40 = vpop.f32.mrb[0].mxu0 }
 0x138   : > { %v1054_v41 = vpop.f32.mrb[0].mxu1  ;;  %v1033_v42 = vpop.f32.mrb[1].mxu0 }
 0x139   : > { %v1034_v43 = vadd.f32 %v1033_v42, %v1032_v40  ;;  %v1055_v44 = vpop.f32.mrb[1].mxu1  ;;  %v1035_v45 = vpop.f32.mrb[2].mxu0 }
 0x13a   : > { %v1056_v46 = vadd.f32 %v1055_v44, %v1054_v41  ;;  %v1057_v47 = vpop.f32.mrb[2].mxu1  ;;  %v1036_v48 = vpop.f32.mrb[3].mxu0 }
 0x13b   : > { %v1058_v49 = vpop.f32.mrb[3].mxu1 }
 0x13c   : > { %v856_v51 = vadd.f32 %v1056_v46, %v1034_v43 }
 0x13e   : > { %v873_v52 = vadd.f32 %v871_v50, %v856_v51 }
 0x140   : > { %v1013_v53 = vmul.f32 -1.442695, %v873_v52 }
 0x142   : > { %1138 = vpow2.f32 %v1013_v53 }
 0x14c   : > { %v1139_v54 = vpop.eup %1138 }
 0x14d   : > { %v877_v55 = vadd.f32 1.0, %v1139_v54 }
 0x14f   : > { %1140 = vrcp.f32 %v877_v55 }
 0x159   : > { %v1141_v56 = vpop.eup %1140 }
 0x15a   : > { %v880_v57 = vpack.c.bf16 %v1141_v56, %v1141_v56 }
 0x15c   : > { %881 = vst [vmem:[%s501_s18] sm:$0xf] %v880_v57 }
 0x15d PF: > { %s13_s16 = sadd.s32 1, %s1180_s16   ;;  %s1460_s12 = smov %s1168_s13 }
 0x15e   : > { %p10_p10 = scmp.ge.s32.totalorder %s13_s16, 4   ;;  %s1461_s13 = smov %s1238_s20 }
 0x15f   : > { %s1462_s14 = smov %s1176_s15  ;;  %s1463_s15 = smov %s1465_s17 }
 0x160   :  { %12 = sbr.rel (!%p10_p10) target bundleno = 3 (0x3), region = 119 }

</bundles_post_ra>
